<compile_context>
chip_gen: v7x
topology: tpu7x:2x2x1
jax: 0.10.0
libtpu: 0.0.40
codegen_flags: <defaults>
</compile_context>

<pallas_src>
import numpy as np
import jax
import jax.numpy as jnp
from jax import lax
from jax.experimental import pallas as pl
from jax.experimental.pallas import tpu as pltpu

N_BATCH = 2
C_IN, C_OUT = 3, 18
H = W = 32              # input spatial; pool(2) -> 16x16, so 18*16*16 = 4608 matches fc1
HP = WP = H // 2        # pooled spatial
PIX = HP * WP           # 256 pooled pixels / sample
FEAT = C_OUT * PIX      # 4608
HID = 64
N_CLS = 10
KPATCH = C_IN * 9       # 27


# ----------------------------------------------------------------------------
# Fused kernel: conv(3x3,pad=1) + ReLU + 2x2 max-pool + fc1 + ReLU + out.
#   patches_ref: (27, 4*npix) bf16   lanes = (pool_pos, sample, h, w)
#   wc_ref:      (18, 27)     bf16   rows = out channel, cols = (c, kh, kw)
#   bc_ref:      (18, 1)      f32
#   w1_ref:      (18, 64, 256) bf16  w1_ref[c, o, h*16+w] = fc1.weight[o, c*256+h*16+w]
#   b1_ref:      (1, 64)      f32
#   w2_ref:      (10, 64)     bf16   native PyTorch (out, in)
#   b2_ref:      (1, 10)      f32
#   o_ref:       (n, 10)      f32
# ----------------------------------------------------------------------------
def fused_cnn_kernel(patches_ref, wc_ref, bc_ref, w1_ref, b1_ref, w2_ref, b2_ref, o_ref):
    n = o_ref.shape[0]
    npix = n * PIX                      # multiple of 256 -> all lane slices tile-aligned
    dn = (((1,), (1,)), ((), ()))       # contract last dims: x @ w.T

    # conv as ONE MXU matmul: (18,27) @ (27, 4*npix) -> f32
    s = jnp.dot(wc_ref[...], patches_ref[...], preferred_element_type=jnp.float32)

    # 2x2 max-pool = max over the 4 pool-position lane groups (each npix wide).
    m = jnp.maximum(jnp.maximum(s[:, 0 * npix:1 * npix], s[:, 1 * npix:2 * npix]),
                    jnp.maximum(s[:, 2 * npix:3 * npix], s[:, 3 * npix:4 * npix]))

    # Per-channel bias + ReLU AFTER the max (valid: bias uniform over the window, ReLU monotone).
    act = jnp.maximum(m + bc_ref[...], 0.0)          # (18, npix) f32, lanes = (sample, h, w)

    # fc1 + ReLU + out, per sample.  The fc1 contraction mixes the channel (sublane) and pixel
    # (lane) axes, so it is unrolled as sum_c of (1,256)@(256,64) MXU dots against w1_ref[c]:
    # only the weight was relaid out (outside jit), never the activations.
    for i in range(n):
        a_i = act[:, i * PIX:(i + 1) * PIX]          # (18, 256), lanes = h*16 + w
        h_i = b1_ref[...]                            # (1, 64) f32 accumulator
        for c in range(C_OUT):
            a_ci = a_i[c:c + 1, :].astype(jnp.bfloat16)          # (1, 256)
            h_i = h_i + lax.dot_general(a_ci, w1_ref[c], dn,
                                        preferred_element_type=jnp.float32)
        h_i = jnp.maximum(h_i, 0.0).astype(jnp.bfloat16)         # (1, 64)
        o_ref[i:i + 1, :] = (lax.dot_general(h_i, w2_ref[...], dn,
                                             preferred_element_type=jnp.float32)
                             + b2_ref[...])                      # (1, 10) f32


def _vmem_specs(k):
    return [pl.BlockSpec(memory_space=pltpu.MemorySpace.VMEM) for _ in range(k)]


def prepare_params(params):
    """One-time (outside jit) weight relayout / bf16 cast."""
    wconv, bconv, w1, b1, w2, b2 = params
    return (wconv.reshape(C_OUT, KPATCH).astype(jnp.bfloat16),            # (18, 27), (c,kh,kw)
            bconv.reshape(C_OUT, 1).astype(jnp.float32),                  # (18, 1)
            jnp.transpose(w1.reshape(HID, C_OUT, PIX), (1, 0, 2))
               .astype(jnp.bfloat16),                                     # (18, 64, 256)
            b1.reshape(1, HID).astype(jnp.float32),
            w2.astype(jnp.bfloat16),                                      # (10, 64), native
            b2.reshape(1, N_CLS).astype(jnp.float32))


def simple_cnn_forward(x, prepped):
    """x: (N, 3, 32, 32) float32 NCHW (PyTorch layout); prepped = prepare_params(...)."""
    wc, bc, w1r, b1r, w2b, b2r = prepped
    n = x.shape[0]
    npix = n * PIX

    # ---- glue: im2col in the pool-grouped (27, 4*npix) layout, ~14 HLOs total ----
    x_pad = jnp.pad(x, ((0, 0), (0, 0), (1, 1), (1, 1)))                  # (n, 3, 34, 34)
    shifted = jnp.stack([x_pad[:, :, kh:kh + H, kw:kw + W]                # 9 contiguous shifts
                         for kh in range(3) for kw in range(3)], axis=0)  # (9, n, 3, 32, 32)
    shifted = shifted.reshape(9, n, C_IN, HP, 2, WP, 2)                   # y->(h,ph), x->(w,pw)
    patches = (shifted.transpose(2, 0, 4, 6, 1, 3, 5)                     # (c,khkw,ph,pw,n,h,w)
                      .reshape(KPATCH, 4 * npix)
                      .astype(jnp.bfloat16))                              # rows=(c,kh,kw)

    return pl.pallas_call(
        fused_cnn_kernel,
        out_shape=jax.ShapeDtypeStruct((n, N_CLS), jnp.float32),
        in_specs=_vmem_specs(7),
        out_specs=pl.BlockSpec(memory_space=pltpu.MemorySpace.VMEM),
    )(patches, wc, bc, w1r, b1r, w2b, b2r)


def reference_forward(x, params):
    """Pure-JAX f32 reference mirroring the PyTorch module exactly."""
    wconv, bconv, w1, b1, w2, b2 = params
    y = lax.conv_general_dilated(
        x, wconv, window_strides=(1, 1), padding="SAME",
        dimension_numbers=("NCHW", "OIHW", "NCHW"))
    y = jnp.maximum(y + bconv[None, :, None, None], 0.0)
    y = lax.reduce_window(y, -jnp.inf, lax.max,
                          window_dimensions=(1, 1, 2, 2),
                          window_strides=(1, 1, 2, 2), padding="VALID")
    flat = y.reshape(x.shape[0], FEAT)
    h = jnp.maximum(flat @ w1.T + b1, 0.0)
    return h @ w2.T + b2


def init_params(key):
    """Deterministic synthetic parameters, PyTorch-shaped."""
    k = jax.random.split(key, 6)
    wconv = jax.random.normal(k[0], (C_OUT, C_IN, 3, 3), jnp.float32) / np.sqrt(C_IN * 9)
    bconv = jax.random.normal(k[1], (C_OUT,), jnp.float32) * 0.1
    w1 = jax.random.normal(k[2], (HID, FEAT), jnp.float32) / np.sqrt(FEAT)
    b1 = jax.random.normal(k[3], (HID,), jnp.float32) * 0.1
    w2 = jax.random.normal(k[4], (N_CLS, HID), jnp.float32) / np.sqrt(HID)
    b2 = jax.random.normal(k[5], (N_CLS,), jnp.float32) * 0.1
    return (wconv, bconv, w1, b1, w2, b2)


if __name__ == "__main__":
    key = jax.random.PRNGKey(0)
    kx, kp = jax.random.split(key)
    x = jax.random.normal(kx, (N_BATCH, C_IN, H, W), jnp.float32)
    params = init_params(kp)
    prepped = prepare_params(params)   # one-time weight relayout / bf16 cast, outside jit

    fwd = jax.jit(simple_cnn_forward)
    out = jax.block_until_ready(fwd(x, prepped))
    assert out.shape == (N_BATCH, N_CLS) and out.dtype == jnp.float32

    ref = reference_forward(x, params)
    np.testing.assert_allclose(np.asarray(out), np.asarray(ref), rtol=2e-2, atol=2e-2)

    print("KERNEL_OK")
</pallas_src>

<mosaic_0001>
module attributes {stable_mosaic.version = 11 : i64} {
  func.func @fused_cnn_kernel(%arg0: memref<27x2048xbf16, #tpu.memory_space<vmem>>, %arg1: memref<18x27xbf16, #tpu.memory_space<vmem>>, %arg2: memref<18x1xf32, #tpu.memory_space<vmem>>, %arg3: memref<18x64x256xbf16, #tpu.memory_space<vmem>>, %arg4: memref<1x64xf32, #tpu.memory_space<vmem>>, %arg5: memref<10x64xbf16, #tpu.memory_space<vmem>>, %arg6: memref<1x10xf32, #tpu.memory_space<vmem>>, %arg7: memref<2x10xf32, #tpu.memory_space<vmem>>) attributes {dimension_semantics = [], scalar_prefetch = 0 : i64, scratch_operands = 0 : i64, tpu.core_type = #tpu.core_type<tc>} {
    %c0 = arith.constant 0 : index
    %c0_0 = arith.constant 0 : index
    %0 = vector.load %arg1[%c0, %c0_0] : memref<18x27xbf16, #tpu.memory_space<vmem>>, vector<18x27xbf16>
    %c0_1 = arith.constant 0 : index
    %c0_2 = arith.constant 0 : index
    %1 = vector.load %arg0[%c0_1, %c0_2] : memref<27x2048xbf16, #tpu.memory_space<vmem>>, vector<27x2048xbf16>
    %cst = arith.constant dense<0.000000e+00> : vector<18x2048xf32>
    %2 = tpu.matmul %0, %1, %cst {dimension_numbers = #tpu.dot_dimension_numbers<[1], [0], [0], [1], [0, 0, 1, 1], [], []>} : vector<18x27xbf16>, vector<27x2048xbf16>, vector<18x2048xf32> -> vector<18x2048xf32>
    %3 = vector.extract_strided_slice %2 {offsets = [0, 0], sizes = [18, 512], strides = [1, 1]} : vector<18x2048xf32> to vector<18x512xf32>
    %4 = vector.extract_strided_slice %2 {offsets = [0, 512], sizes = [18, 512], strides = [1, 1]} : vector<18x2048xf32> to vector<18x512xf32>
    %5 = arith.maximumf %3, %4 : vector<18x512xf32>
    %6 = vector.extract_strided_slice %2 {offsets = [0, 1024], sizes = [18, 512], strides = [1, 1]} : vector<18x2048xf32> to vector<18x512xf32>
    %7 = vector.extract_strided_slice %2 {offsets = [0, 1536], sizes = [18, 512], strides = [1, 1]} : vector<18x2048xf32> to vector<18x512xf32>
    %8 = arith.maximumf %6, %7 : vector<18x512xf32>
    %9 = arith.maximumf %5, %8 : vector<18x512xf32>
    %c0_3 = arith.constant 0 : index
    %c0_4 = arith.constant 0 : index
    %10 = vector.load %arg2[%c0_3, %c0_4] : memref<18x1xf32, #tpu.memory_space<vmem>>, vector<18x1xf32>
    %11 = vector.broadcast %10 : vector<18x1xf32> to vector<18x512xf32>
    %12 = arith.addf %9, %11 : vector<18x512xf32>
    %cst_5 = arith.constant 0.000000e+00 : f32
    %13 = vector.broadcast %cst_5 : f32 to vector<18x512xf32>
    %14 = arith.maximumf %12, %13 : vector<18x512xf32>
    %15 = vector.extract_strided_slice %14 {offsets = [0, 0], sizes = [18, 256], strides = [1, 1]} : vector<18x512xf32> to vector<18x256xf32>
    %c0_6 = arith.constant 0 : index
    %c0_7 = arith.constant 0 : index
    %16 = vector.load %arg4[%c0_6, %c0_7] : memref<1x64xf32, #tpu.memory_space<vmem>>, vector<1x64xf32>
    %17 = vector.extract_strided_slice %15 {offsets = [0, 0], sizes = [1, 256], strides = [1, 1]} : vector<18x256xf32> to vector<1x256xf32>
    %18 = arith.truncf %17 : vector<1x256xf32> to vector<1x256xbf16>
    %c0_8 = arith.constant 0 : index
    %c0_9 = arith.constant 0 : index
    %c0_10 = arith.constant 0 : index
    %19 = vector.load %arg3[%c0_8, %c0_9, %c0_10] : memref<18x64x256xbf16, #tpu.memory_space<vmem>>, vector<1x64x256xbf16>
    %20 = vector.shape_cast %19 : vector<1x64x256xbf16> to vector<64x256xbf16>
    %cst_11 = arith.constant dense<0.000000e+00> : vector<1x64xf32>
    %21 = tpu.matmul %18, %20, %cst_11 {dimension_numbers = #tpu.dot_dimension_numbers<[1], [1], [0], [0], [0, 0, 1, 0], [], []>} : vector<1x256xbf16>, vector<64x256xbf16>, vector<1x64xf32> -> vector<1x64xf32>
    %22 = arith.addf %16, %21 : vector<1x64xf32>
    %23 = vector.extract_strided_slice %15 {offsets = [1, 0], sizes = [1, 256], strides = [1, 1]} : vector<18x256xf32> to vector<1x256xf32>
    %24 = arith.truncf %23 : vector<1x256xf32> to vector<1x256xbf16>
    %c1 = arith.constant 1 : index
    %c0_12 = arith.constant 0 : index
    %c0_13 = arith.constant 0 : index
    %25 = vector.load %arg3[%c1, %c0_12, %c0_13] : memref<18x64x256xbf16, #tpu.memory_space<vmem>>, vector<1x64x256xbf16>
    %26 = vector.shape_cast %25 : vector<1x64x256xbf16> to vector<64x256xbf16>
    %cst_14 = arith.constant dense<0.000000e+00> : vector<1x64xf32>
    %27 = tpu.matmul %24, %26, %cst_14 {dimension_numbers = #tpu.dot_dimension_numbers<[1], [1], [0], [0], [0, 0, 1, 0], [], []>} : vector<1x256xbf16>, vector<64x256xbf16>, vector<1x64xf32> -> vector<1x64xf32>
    %28 = arith.addf %22, %27 : vector<1x64xf32>
    %29 = vector.extract_strided_slice %15 {offsets = [2, 0], sizes = [1, 256], strides = [1, 1]} : vector<18x256xf32> to vector<1x256xf32>
    %30 = arith.truncf %29 : vector<1x256xf32> to vector<1x256xbf16>
    %c2 = arith.constant 2 : index
    %c0_15 = arith.constant 0 : index
    %c0_16 = arith.constant 0 : index
    %31 = vector.load %arg3[%c2, %c0_15, %c0_16] : memref<18x64x256xbf16, #tpu.memory_space<vmem>>, vector<1x64x256xbf16>
    %32 = vector.shape_cast %31 : vector<1x64x256xbf16> to vector<64x256xbf16>
    %cst_17 = arith.constant dense<0.000000e+00> : vector<1x64xf32>
    %33 = tpu.matmul %30, %32, %cst_17 {dimension_numbers = #tpu.dot_dimension_numbers<[1], [1], [0], [0], [0, 0, 1, 0], [], []>} : vector<1x256xbf16>, vector<64x256xbf16>, vector<1x64xf32> -> vector<1x64xf32>
    %34 = arith.addf %28, %33 : vector<1x64xf32>
    %35 = vector.extract_strided_slice %15 {offsets = [3, 0], sizes = [1, 256], strides = [1, 1]} : vector<18x256xf32> to vector<1x256xf32>
    %36 = arith.truncf %35 : vector<1x256xf32> to vector<1x256xbf16>
    %c3 = arith.constant 3 : index
    %c0_18 = arith.constant 0 : index
    %c0_19 = arith.constant 0 : index
    %37 = vector.load %arg3[%c3, %c0_18, %c0_19] : memref<18x64x256xbf16, #tpu.memory_space<vmem>>, vector<1x64x256xbf16>
    %38 = vector.shape_cast %37 : vector<1x64x256xbf16> to vector<64x256xbf16>
    %cst_20 = arith.constant dense<0.000000e+00> : vector<1x64xf32>
    %39 = tpu.matmul %36, %38, %cst_20 {dimension_numbers = #tpu.dot_dimension_numbers<[1], [1], [0], [0], [0, 0, 1, 0], [], []>} : vector<1x256xbf16>, vector<64x256xbf16>, vector<1x64xf32> -> vector<1x64xf32>
    %40 = arith.addf %34, %39 : vector<1x64xf32>
    %41 = vector.extract_strided_slice %15 {offsets = [4, 0], sizes = [1, 256], strides = [1, 1]} : vector<18x256xf32> to vector<1x256xf32>
    %42 = arith.truncf %41 : vector<1x256xf32> to vector<1x256xbf16>
    %c4 = arith.constant 4 : index
    %c0_21 = arith.constant 0 : index
    %c0_22 = arith.constant 0 : index
    %43 = vector.load %arg3[%c4, %c0_21, %c0_22] : memref<18x64x256xbf16, #tpu.memory_space<vmem>>, vector<1x64x256xbf16>
    %44 = vector.shape_cast %43 : vector<1x64x256xbf16> to vector<64x256xbf16>
    %cst_23 = arith.constant dense<0.000000e+00> : vector<1x64xf32>
    %45 = tpu.matmul %42, %44, %cst_23 {dimension_numbers = #tpu.dot_dimension_numbers<[1], [1], [0], [0], [0, 0, 1, 0], [], []>} : vector<1x256xbf16>, vector<64x256xbf16>, vector<1x64xf32> -> vector<1x64xf32>
    %46 = arith.addf %40, %45 : vector<1x64xf32>
    %47 = vector.extract_strided_slice %15 {offsets = [5, 0], sizes = [1, 256], strides = [1, 1]} : vector<18x256xf32> to vector<1x256xf32>
    %48 = arith.truncf %47 : vector<1x256xf32> to vector<1x256xbf16>
    %c5 = arith.constant 5 : index
    %c0_24 = arith.constant 0 : index
    %c0_25 = arith.constant 0 : index
    %49 = vector.load %arg3[%c5, %c0_24, %c0_25] : memref<18x64x256xbf16, #tpu.memory_space<vmem>>, vector<1x64x256xbf16>
    %50 = vector.shape_cast %49 : vector<1x64x256xbf16> to vector<64x256xbf16>
    %cst_26 = arith.constant dense<0.000000e+00> : vector<1x64xf32>
    %51 = tpu.matmul %48, %50, %cst_26 {dimension_numbers = #tpu.dot_dimension_numbers<[1], [1], [0], [0], [0, 0, 1, 0], [], []>} : vector<1x256xbf16>, vector<64x256xbf16>, vector<1x64xf32> -> vector<1x64xf32>
    %52 = arith.addf %46, %51 : vector<1x64xf32>
    %53 = vector.extract_strided_slice %15 {offsets = [6, 0], sizes = [1, 256], strides = [1, 1]} : vector<18x256xf32> to vector<1x256xf32>
    %54 = arith.truncf %53 : vector<1x256xf32> to vector<1x256xbf16>
    %c6 = arith.constant 6 : index
    %c0_27 = arith.constant 0 : index
    %c0_28 = arith.constant 0 : index
    %55 = vector.load %arg3[%c6, %c0_27, %c0_28] : memref<18x64x256xbf16, #tpu.memory_space<vmem>>, vector<1x64x256xbf16>
    %56 = vector.shape_cast %55 : vector<1x64x256xbf16> to vector<64x256xbf16>
    %cst_29 = arith.constant dense<0.000000e+00> : vector<1x64xf32>
    %57 = tpu.matmul %54, %56, %cst_29 {dimension_numbers = #tpu.dot_dimension_numbers<[1], [1], [0], [0], [0, 0, 1, 0], [], []>} : vector<1x256xbf16>, vector<64x256xbf16>, vector<1x64xf32> -> vector<1x64xf32>
    %58 = arith.addf %52, %57 : vector<1x64xf32>
    %59 = vector.extract_strided_slice %15 {offsets = [7, 0], sizes = [1, 256], strides = [1, 1]} : vector<18x256xf32> to vector<1x256xf32>
    %60 = arith.truncf %59 : vector<1x256xf32> to vector<1x256xbf16>
    %c7 = arith.constant 7 : index
    %c0_30 = arith.constant 0 : index
    %c0_31 = arith.constant 0 : index
    %61 = vector.load %arg3[%c7, %c0_30, %c0_31] : memref<18x64x256xbf16, #tpu.memory_space<vmem>>, vector<1x64x256xbf16>
    %62 = vector.shape_cast %61 : vector<1x64x256xbf16> to vector<64x256xbf16>
    %cst_32 = arith.constant dense<0.000000e+00> : vector<1x64xf32>
    %63 = tpu.matmul %60, %62, %cst_32 {dimension_numbers = #tpu.dot_dimension_numbers<[1], [1], [0], [0], [0, 0, 1, 0], [], []>} : vector<1x256xbf16>, vector<64x256xbf16>, vector<1x64xf32> -> vector<1x64xf32>
    %64 = arith.addf %58, %63 : vector<1x64xf32>
    %65 = vector.extract_strided_slice %15 {offsets = [8, 0], sizes = [1, 256], strides = [1, 1]} : vector<18x256xf32> to vector<1x256xf32>
    %66 = arith.truncf %65 : vector<1x256xf32> to vector<1x256xbf16>
    %c8 = arith.constant 8 : index
    %c0_33 = arith.constant 0 : index
    %c0_34 = arith.constant 0 : index
    %67 = vector.load %arg3[%c8, %c0_33, %c0_34] : memref<18x64x256xbf16, #tpu.memory_space<vmem>>, vector<1x64x256xbf16>
    %68 = vector.shape_cast %67 : vector<1x64x256xbf16> to vector<64x256xbf16>
    %cst_35 = arith.constant dense<0.000000e+00> : vector<1x64xf32>
    %69 = tpu.matmul %66, %68, %cst_35 {dimension_numbers = #tpu.dot_dimension_numbers<[1], [1], [0], [0], [0, 0, 1, 0], [], []>} : vector<1x256xbf16>, vector<64x256xbf16>, vector<1x64xf32> -> vector<1x64xf32>
    %70 = arith.addf %64, %69 : vector<1x64xf32>
    %71 = vector.extract_strided_slice %15 {offsets = [9, 0], sizes = [1, 256], strides = [1, 1]} : vector<18x256xf32> to vector<1x256xf32>
    %72 = arith.truncf %71 : vector<1x256xf32> to vector<1x256xbf16>
    %c9 = arith.constant 9 : index
    %c0_36 = arith.constant 0 : index
    %c0_37 = arith.constant 0 : index
    %73 = vector.load %arg3[%c9, %c0_36, %c0_37] : memref<18x64x256xbf16, #tpu.memory_space<vmem>>, vector<1x64x256xbf16>
    %74 = vector.shape_cast %73 : vector<1x64x256xbf16> to vector<64x256xbf16>
    %cst_38 = arith.constant dense<0.000000e+00> : vector<1x64xf32>
    %75 = tpu.matmul %72, %74, %cst_38 {dimension_numbers = #tpu.dot_dimension_numbers<[1], [1], [0], [0], [0, 0, 1, 0], [], []>} : vector<1x256xbf16>, vector<64x256xbf16>, vector<1x64xf32> -> vector<1x64xf32>
    %76 = arith.addf %70, %75 : vector<1x64xf32>
    %77 = vector.extract_strided_slice %15 {offsets = [10, 0], sizes = [1, 256], strides = [1, 1]} : vector<18x256xf32> to vector<1x256xf32>
    %78 = arith.truncf %77 : vector<1x256xf32> to vector<1x256xbf16>
    %c10 = arith.constant 10 : index
    %c0_39 = arith.constant 0 : index
    %c0_40 = arith.constant 0 : index
    %79 = vector.load %arg3[%c10, %c0_39, %c0_40] : memref<18x64x256xbf16, #tpu.memory_space<vmem>>, vector<1x64x256xbf16>
    %80 = vector.shape_cast %79 : vector<1x64x256xbf16> to vector<64x256xbf16>
    %cst_41 = arith.constant dense<0.000000e+00> : vector<1x64xf32>
    %81 = tpu.matmul %78, %80, %cst_41 {dimension_numbers = #tpu.dot_dimension_numbers<[1], [1], [0], [0], [0, 0, 1, 0], [], []>} : vector<1x256xbf16>, vector<64x256xbf16>, vector<1x64xf32> -> vector<1x64xf32>
    %82 = arith.addf %76, %81 : vector<1x64xf32>
    %83 = vector.extract_strided_slice %15 {offsets = [11, 0], sizes = [1, 256], strides = [1, 1]} : vector<18x256xf32> to vector<1x256xf32>
    %84 = arith.truncf %83 : vector<1x256xf32> to vector<1x256xbf16>
    %c11 = arith.constant 11 : index
    %c0_42 = arith.constant 0 : index
    %c0_43 = arith.constant 0 : index
    %85 = vector.load %arg3[%c11, %c0_42, %c0_43] : memref<18x64x256xbf16, #tpu.memory_space<vmem>>, vector<1x64x256xbf16>
    %86 = vector.shape_cast %85 : vector<1x64x256xbf16> to vector<64x256xbf16>
    %cst_44 = arith.constant dense<0.000000e+00> : vector<1x64xf32>
    %87 = tpu.matmul %84, %86, %cst_44 {dimension_numbers = #tpu.dot_dimension_numbers<[1], [1], [0], [0], [0, 0, 1, 0], [], []>} : vector<1x256xbf16>, vector<64x256xbf16>, vector<1x64xf32> -> vector<1x64xf32>
    %88 = arith.addf %82, %87 : vector<1x64xf32>
    %89 = vector.extract_strided_slice %15 {offsets = [12, 0], sizes = [1, 256], strides = [1, 1]} : vector<18x256xf32> to vector<1x256xf32>
    %90 = arith.truncf %89 : vector<1x256xf32> to vector<1x256xbf16>
    %c12 = arith.constant 12 : index
    %c0_45 = arith.constant 0 : index
    %c0_46 = arith.constant 0 : index
    %91 = vector.load %arg3[%c12, %c0_45, %c0_46] : memref<18x64x256xbf16, #tpu.memory_space<vmem>>, vector<1x64x256xbf16>
    %92 = vector.shape_cast %91 : vector<1x64x256xbf16> to vector<64x256xbf16>
    %cst_47 = arith.constant dense<0.000000e+00> : vector<1x64xf32>
    %93 = tpu.matmul %90, %92, %cst_47 {dimension_numbers = #tpu.dot_dimension_numbers<[1], [1], [0], [0], [0, 0, 1, 0], [], []>} : vector<1x256xbf16>, vector<64x256xbf16>, vector<1x64xf32> -> vector<1x64xf32>
    %94 = arith.addf %88, %93 : vector<1x64xf32>
    %95 = vector.extract_strided_slice %15 {offsets = [13, 0], sizes = [1, 256], strides = [1, 1]} : vector<18x256xf32> to vector<1x256xf32>
    %96 = arith.truncf %95 : vector<1x256xf32> to vector<1x256xbf16>
    %c13 = arith.constant 13 : index
    %c0_48 = arith.constant 0 : index
    %c0_49 = arith.constant 0 : index
    %97 = vector.load %arg3[%c13, %c0_48, %c0_49] : memref<18x64x256xbf16, #tpu.memory_space<vmem>>, vector<1x64x256xbf16>
    %98 = vector.shape_cast %97 : vector<1x64x256xbf16> to vector<64x256xbf16>
    %cst_50 = arith.constant dense<0.000000e+00> : vector<1x64xf32>
    %99 = tpu.matmul %96, %98, %cst_50 {dimension_numbers = #tpu.dot_dimension_numbers<[1], [1], [0], [0], [0, 0, 1, 0], [], []>} : vector<1x256xbf16>, vector<64x256xbf16>, vector<1x64xf32> -> vector<1x64xf32>
    %100 = arith.addf %94, %99 : vector<1x64xf32>
    %101 = vector.extract_strided_slice %15 {offsets = [14, 0], sizes = [1, 256], strides = [1, 1]} : vector<18x256xf32> to vector<1x256xf32>
    %102 = arith.truncf %101 : vector<1x256xf32> to vector<1x256xbf16>
    %c14 = arith.constant 14 : index
    %c0_51 = arith.constant 0 : index
    %c0_52 = arith.constant 0 : index
    %103 = vector.load %arg3[%c14, %c0_51, %c0_52] : memref<18x64x256xbf16, #tpu.memory_space<vmem>>, vector<1x64x256xbf16>
    %104 = vector.shape_cast %103 : vector<1x64x256xbf16> to vector<64x256xbf16>
    %cst_53 = arith.constant dense<0.000000e+00> : vector<1x64xf32>
    %105 = tpu.matmul %102, %104, %cst_53 {dimension_numbers = #tpu.dot_dimension_numbers<[1], [1], [0], [0], [0, 0, 1, 0], [], []>} : vector<1x256xbf16>, vector<64x256xbf16>, vector<1x64xf32> -> vector<1x64xf32>
    %106 = arith.addf %100, %105 : vector<1x64xf32>
    %107 = vector.extract_strided_slice %15 {offsets = [15, 0], sizes = [1, 256], strides = [1, 1]} : vector<18x256xf32> to vector<1x256xf32>
    %108 = arith.truncf %107 : vector<1x256xf32> to vector<1x256xbf16>
    %c15 = arith.constant 15 : index
    %c0_54 = arith.constant 0 : index
    %c0_55 = arith.constant 0 : index
    %109 = vector.load %arg3[%c15, %c0_54, %c0_55] : memref<18x64x256xbf16, #tpu.memory_space<vmem>>, vector<1x64x256xbf16>
    %110 = vector.shape_cast %109 : vector<1x64x256xbf16> to vector<64x256xbf16>
    %cst_56 = arith.constant dense<0.000000e+00> : vector<1x64xf32>
    %111 = tpu.matmul %108, %110, %cst_56 {dimension_numbers = #tpu.dot_dimension_numbers<[1], [1], [0], [0], [0, 0, 1, 0], [], []>} : vector<1x256xbf16>, vector<64x256xbf16>, vector<1x64xf32> -> vector<1x64xf32>
    %112 = arith.addf %106, %111 : vector<1x64xf32>
    %113 = vector.extract_strided_slice %15 {offsets = [16, 0], sizes = [1, 256], strides = [1, 1]} : vector<18x256xf32> to vector<1x256xf32>
    %114 = arith.truncf %113 : vector<1x256xf32> to vector<1x256xbf16>
    %c16 = arith.constant 16 : index
    %c0_57 = arith.constant 0 : index
    %c0_58 = arith.constant 0 : index
    %115 = vector.load %arg3[%c16, %c0_57, %c0_58] : memref<18x64x256xbf16, #tpu.memory_space<vmem>>, vector<1x64x256xbf16>
    %116 = vector.shape_cast %115 : vector<1x64x256xbf16> to vector<64x256xbf16>
    %cst_59 = arith.constant dense<0.000000e+00> : vector<1x64xf32>
    %117 = tpu.matmul %114, %116, %cst_59 {dimension_numbers = #tpu.dot_dimension_numbers<[1], [1], [0], [0], [0, 0, 1, 0], [], []>} : vector<1x256xbf16>, vector<64x256xbf16>, vector<1x64xf32> -> vector<1x64xf32>
    %118 = arith.addf %112, %117 : vector<1x64xf32>
    %119 = vector.extract_strided_slice %15 {offsets = [17, 0], sizes = [1, 256], strides = [1, 1]} : vector<18x256xf32> to vector<1x256xf32>
    %120 = arith.truncf %119 : vector<1x256xf32> to vector<1x256xbf16>
    %c17 = arith.constant 17 : index
    %c0_60 = arith.constant 0 : index
    %c0_61 = arith.constant 0 : index
    %121 = vector.load %arg3[%c17, %c0_60, %c0_61] : memref<18x64x256xbf16, #tpu.memory_space<vmem>>, vector<1x64x256xbf16>
    %122 = vector.shape_cast %121 : vector<1x64x256xbf16> to vector<64x256xbf16>
    %cst_62 = arith.constant dense<0.000000e+00> : vector<1x64xf32>
    %123 = tpu.matmul %120, %122, %cst_62 {dimension_numbers = #tpu.dot_dimension_numbers<[1], [1], [0], [0], [0, 0, 1, 0], [], []>} : vector<1x256xbf16>, vector<64x256xbf16>, vector<1x64xf32> -> vector<1x64xf32>
    %124 = arith.addf %118, %123 : vector<1x64xf32>
    %cst_63 = arith.constant 0.000000e+00 : f32
    %125 = vector.broadcast %cst_63 : f32 to vector<1x64xf32>
    %126 = arith.maximumf %124, %125 : vector<1x64xf32>
    %127 = arith.truncf %126 : vector<1x64xf32> to vector<1x64xbf16>
    %c0_64 = arith.constant 0 : index
    %c0_65 = arith.constant 0 : index
    %128 = vector.load %arg5[%c0_64, %c0_65] : memref<10x64xbf16, #tpu.memory_space<vmem>>, vector<10x64xbf16>
    %cst_66 = arith.constant dense<0.000000e+00> : vector<1x10xf32>
    %129 = tpu.matmul %127, %128, %cst_66 {dimension_numbers = #tpu.dot_dimension_numbers<[1], [1], [0], [0], [0, 0, 1, 0], [], []>} : vector<1x64xbf16>, vector<10x64xbf16>, vector<1x10xf32> -> vector<1x10xf32>
    %c0_67 = arith.constant 0 : index
    %c0_68 = arith.constant 0 : index
    %130 = vector.load %arg6[%c0_67, %c0_68] : memref<1x10xf32, #tpu.memory_space<vmem>>, vector<1x10xf32>
    %131 = arith.addf %129, %130 : vector<1x10xf32>
    %c0_69 = arith.constant 0 : index
    %c0_70 = arith.constant 0 : index
    %132 = vector.load %arg7[%c0_69, %c0_70] : memref<2x10xf32, #tpu.memory_space<vmem>>, vector<1x10xf32>
    tpu.vector_store %arg7[%c0_69, %c0_70], %131 {strides = array<i32>} : memref<2x10xf32, #tpu.memory_space<vmem>>, vector<1x10xf32>,
    %133 = vector.extract_strided_slice %14 {offsets = [0, 256], sizes = [18, 256], strides = [1, 1]} : vector<18x512xf32> to vector<18x256xf32>
    %c0_71 = arith.constant 0 : index
    %c0_72 = arith.constant 0 : index
    %134 = vector.load %arg4[%c0_71, %c0_72] : memref<1x64xf32, #tpu.memory_space<vmem>>, vector<1x64xf32>
    %135 = vector.extract_strided_slice %133 {offsets = [0, 0], sizes = [1, 256], strides = [1, 1]} : vector<18x256xf32> to vector<1x256xf32>
    %136 = arith.truncf %135 : vector<1x256xf32> to vector<1x256xbf16>
    %c0_73 = arith.constant 0 : index
    %c0_74 = arith.constant 0 : index
    %c0_75 = arith.constant 0 : index
    %137 = vector.load %arg3[%c0_73, %c0_74, %c0_75] : memref<18x64x256xbf16, #tpu.memory_space<vmem>>, vector<1x64x256xbf16>
    %138 = vector.shape_cast %137 : vector<1x64x256xbf16> to vector<64x256xbf16>
    %cst_76 = arith.constant dense<0.000000e+00> : vector<1x64xf32>
    %139 = tpu.matmul %136, %138, %cst_76 {dimension_numbers = #tpu.dot_dimension_numbers<[1], [1], [0], [0], [0, 0, 1, 0], [], []>} : vector<1x256xbf16>, vector<64x256xbf16>, vector<1x64xf32> -> vector<1x64xf32>
    %140 = arith.addf %134, %139 : vector<1x64xf32>
    %141 = vector.extract_strided_slice %133 {offsets = [1, 0], sizes = [1, 256], strides = [1, 1]} : vector<18x256xf32> to vector<1x256xf32>
    %142 = arith.truncf %141 : vector<1x256xf32> to vector<1x256xbf16>
    %c1_77 = arith.constant 1 : index
    %c0_78 = arith.constant 0 : index
    %c0_79 = arith.constant 0 : index
    %143 = vector.load %arg3[%c1_77, %c0_78, %c0_79] : memref<18x64x256xbf16, #tpu.memory_space<vmem>>, vector<1x64x256xbf16>
    %144 = vector.shape_cast %143 : vector<1x64x256xbf16> to vector<64x256xbf16>
    %cst_80 = arith.constant dense<0.000000e+00> : vector<1x64xf32>
    %145 = tpu.matmul %142, %144, %cst_80 {dimension_numbers = #tpu.dot_dimension_numbers<[1], [1], [0], [0], [0, 0, 1, 0], [], []>} : vector<1x256xbf16>, vector<64x256xbf16>, vector<1x64xf32> -> vector<1x64xf32>
    %146 = arith.addf %140, %145 : vector<1x64xf32>
    %147 = vector.extract_strided_slice %133 {offsets = [2, 0], sizes = [1, 256], strides = [1, 1]} : vector<18x256xf32> to vector<1x256xf32>
    %148 = arith.truncf %147 : vector<1x256xf32> to vector<1x256xbf16>
    %c2_81 = arith.constant 2 : index
    %c0_82 = arith.constant 0 : index
    %c0_83 = arith.constant 0 : index
    %149 = vector.load %arg3[%c2_81, %c0_82, %c0_83] : memref<18x64x256xbf16, #tpu.memory_space<vmem>>, vector<1x64x256xbf16>
    %150 = vector.shape_cast %149 : vector<1x64x256xbf16> to vector<64x256xbf16>
    %cst_84 = arith.constant dense<0.000000e+00> : vector<1x64xf32>
    %151 = tpu.matmul %148, %150, %cst_84 {dimension_numbers = #tpu.dot_dimension_numbers<[1], [1], [0], [0], [0, 0, 1, 0], [], []>} : vector<1x256xbf16>, vector<64x256xbf16>, vector<1x64xf32> -> vector<1x64xf32>
    %152 = arith.addf %146, %151 : vector<1x64xf32>
    %153 = vector.extract_strided_slice %133 {offsets = [3, 0], sizes = [1, 256], strides = [1, 1]} : vector<18x256xf32> to vector<1x256xf32>
    %154 = arith.truncf %153 : vector<1x256xf32> to vector<1x256xbf16>
    %c3_85 = arith.constant 3 : index
    %c0_86 = arith.constant 0 : index
    %c0_87 = arith.constant 0 : index
    %155 = vector.load %arg3[%c3_85, %c0_86, %c0_87] : memref<18x64x256xbf16, #tpu.memory_space<vmem>>, vector<1x64x256xbf16>
    %156 = vector.shape_cast %155 : vector<1x64x256xbf16> to vector<64x256xbf16>
    %cst_88 = arith.constant dense<0.000000e+00> : vector<1x64xf32>
    %157 = tpu.matmul %154, %156, %cst_88 {dimension_numbers = #tpu.dot_dimension_numbers<[1], [1], [0], [0], [0, 0, 1, 0], [], []>} : vector<1x256xbf16>, vector<64x256xbf16>, vector<1x64xf32> -> vector<1x64xf32>
    %158 = arith.addf %152, %157 : vector<1x64xf32>
    %159 = vector.extract_strided_slice %133 {offsets = [4, 0], sizes = [1, 256], strides = [1, 1]} : vector<18x256xf32> to vector<1x256xf32>
    %160 = arith.truncf %159 : vector<1x256xf32> to vector<1x256xbf16>
    %c4_89 = arith.constant 4 : index
    %c0_90 = arith.constant 0 : index
    %c0_91 = arith.constant 0 : index
    %161 = vector.load %arg3[%c4_89, %c0_90, %c0_91] : memref<18x64x256xbf16, #tpu.memory_space<vmem>>, vector<1x64x256xbf16>
    %162 = vector.shape_cast %161 : vector<1x64x256xbf16> to vector<64x256xbf16>
    %cst_92 = arith.constant dense<0.000000e+00> : vector<1x64xf32>
    %163 = tpu.matmul %160, %162, %cst_92 {dimension_numbers = #tpu.dot_dimension_numbers<[1], [1], [0], [0], [0, 0, 1, 0], [], []>} : vector<1x256xbf16>, vector<64x256xbf16>, vector<1x64xf32> -> vector<1x64xf32>
    %164 = arith.addf %158, %163 : vector<1x64xf32>
    %165 = vector.extract_strided_slice %133 {offsets = [5, 0], sizes = [1, 256], strides = [1, 1]} : vector<18x256xf32> to vector<1x256xf32>
    %166 = arith.truncf %165 : vector<1x256xf32> to vector<1x256xbf16>
    %c5_93 = arith.constant 5 : index
    %c0_94 = arith.constant 0 : index
    %c0_95 = arith.constant 0 : index
    %167 = vector.load %arg3[%c5_93, %c0_94, %c0_95] : memref<18x64x256xbf16, #tpu.memory_space<vmem>>, vector<1x64x256xbf16>
    %168 = vector.shape_cast %167 : vector<1x64x256xbf16> to vector<64x256xbf16>
    %cst_96 = arith.constant dense<0.000000e+00> : vector<1x64xf32>
    %169 = tpu.matmul %166, %168, %cst_96 {dimension_numbers = #tpu.dot_dimension_numbers<[1], [1], [0], [0], [0, 0, 1, 0], [], []>} : vector<1x256xbf16>, vector<64x256xbf16>, vector<1x64xf32> -> vector<1x64xf32>
    %170 = arith.addf %164, %169 : vector<1x64xf32>
    %171 = vector.extract_strided_slice %133 {offsets = [6, 0], sizes = [1, 256], strides = [1, 1]} : vector<18x256xf32> to vector<1x256xf32>
    %172 = arith.truncf %171 : vector<1x256xf32> to vector<1x256xbf16>
    %c6_97 = arith.constant 6 : index
    %c0_98 = arith.constant 0 : index
    %c0_99 = arith.constant 0 : index
    %173 = vector.load %arg3[%c6_97, %c0_98, %c0_99] : memref<18x64x256xbf16, #tpu.memory_space<vmem>>, vector<1x64x256xbf16>
    %174 = vector.shape_cast %173 : vector<1x64x256xbf16> to vector<64x256xbf16>
    %cst_100 = arith.constant dense<0.000000e+00> : vector<1x64xf32>
    %175 = tpu.matmul %172, %174, %cst_100 {dimension_numbers = #tpu.dot_dimension_numbers<[1], [1], [0], [0], [0, 0, 1, 0], [], []>} : vector<1x256xbf16>, vector<64x256xbf16>, vector<1x64xf32> -> vector<1x64xf32>
    %176 = arith.addf %170, %175 : vector<1x64xf32>
    %177 = vector.extract_strided_slice %133 {offsets = [7, 0], sizes = [1, 256], strides = [1, 1]} : vector<18x256xf32> to vector<1x256xf32>
    %178 = arith.truncf %177 : vector<1x256xf32> to vector<1x256xbf16>
    %c7_101 = arith.constant 7 : index
    %c0_102 = arith.constant 0 : index
    %c0_103 = arith.constant 0 : index
    %179 = vector.load %arg3[%c7_101, %c0_102, %c0_103] : memref<18x64x256xbf16, #tpu.memory_space<vmem>>, vector<1x64x256xbf16>
    %180 = vector.shape_cast %179 : vector<1x64x256xbf16> to vector<64x256xbf16>
    %cst_104 = arith.constant dense<0.000000e+00> : vector<1x64xf32>
    %181 = tpu.matmul %178, %180, %cst_104 {dimension_numbers = #tpu.dot_dimension_numbers<[1], [1], [0], [0], [0, 0, 1, 0], [], []>} : vector<1x256xbf16>, vector<64x256xbf16>, vector<1x64xf32> -> vector<1x64xf32>
    %182 = arith.addf %176, %181 : vector<1x64xf32>
    %183 = vector.extract_strided_slice %133 {offsets = [8, 0], sizes = [1, 256], strides = [1, 1]} : vector<18x256xf32> to vector<1x256xf32>
    %184 = arith.truncf %183 : vector<1x256xf32> to vector<1x256xbf16>
    %c8_105 = arith.constant 8 : index
    %c0_106 = arith.constant 0 : index
    %c0_107 = arith.constant 0 : index
    %185 = vector.load %arg3[%c8_105, %c0_106, %c0_107] : memref<18x64x256xbf16, #tpu.memory_space<vmem>>, vector<1x64x256xbf16>
    %186 = vector.shape_cast %185 : vector<1x64x256xbf16> to vector<64x256xbf16>
    %cst_108 = arith.constant dense<0.000000e+00> : vector<1x64xf32>
    %187 = tpu.matmul %184, %186, %cst_108 {dimension_numbers = #tpu.dot_dimension_numbers<[1], [1], [0], [0], [0, 0, 1, 0], [], []>} : vector<1x256xbf16>, vector<64x256xbf16>, vector<1x64xf32> -> vector<1x64xf32>
    %188 = arith.addf %182, %187 : vector<1x64xf32>
    %189 = vector.extract_strided_slice %133 {offsets = [9, 0], sizes = [1, 256], strides = [1, 1]} : vector<18x256xf32> to vector<1x256xf32>
    %190 = arith.truncf %189 : vector<1x256xf32> to vector<1x256xbf16>
    %c9_109 = arith.constant 9 : index
    %c0_110 = arith.constant 0 : index
    %c0_111 = arith.constant 0 : index
    %191 = vector.load %arg3[%c9_109, %c0_110, %c0_111] : memref<18x64x256xbf16, #tpu.memory_space<vmem>>, vector<1x64x256xbf16>
    %192 = vector.shape_cast %191 : vector<1x64x256xbf16> to vector<64x256xbf16>
    %cst_112 = arith.constant dense<0.000000e+00> : vector<1x64xf32>
    %193 = tpu.matmul %190, %192, %cst_112 {dimension_numbers = #tpu.dot_dimension_numbers<[1], [1], [0], [0], [0, 0, 1, 0], [], []>} : vector<1x256xbf16>, vector<64x256xbf16>, vector<1x64xf32> -> vector<1x64xf32>
    %194 = arith.addf %188, %193 : vector<1x64xf32>
    %195 = vector.extract_strided_slice %133 {offsets = [10, 0], sizes = [1, 256], strides = [1, 1]} : vector<18x256xf32> to vector<1x256xf32>
    %196 = arith.truncf %195 : vector<1x256xf32> to vector<1x256xbf16>
    %c10_113 = arith.constant 10 : index
    %c0_114 = arith.constant 0 : index
    %c0_115 = arith.constant 0 : index
    %197 = vector.load %arg3[%c10_113, %c0_114, %c0_115] : memref<18x64x256xbf16, #tpu.memory_space<vmem>>, vector<1x64x256xbf16>
    %198 = vector.shape_cast %197 : vector<1x64x256xbf16> to vector<64x256xbf16>
    %cst_116 = arith.constant dense<0.000000e+00> : vector<1x64xf32>
    %199 = tpu.matmul %196, %198, %cst_116 {dimension_numbers = #tpu.dot_dimension_numbers<[1], [1], [0], [0], [0, 0, 1, 0], [], []>} : vector<1x256xbf16>, vector<64x256xbf16>, vector<1x64xf32> -> vector<1x64xf32>
    %200 = arith.addf %194, %199 : vector<1x64xf32>
    %201 = vector.extract_strided_slice %133 {offsets = [11, 0], sizes = [1, 256], strides = [1, 1]} : vector<18x256xf32> to vector<1x256xf32>
    %202 = arith.truncf %201 : vector<1x256xf32> to vector<1x256xbf16>
    %c11_117 = arith.constant 11 : index
    %c0_118 = arith.constant 0 : index
    %c0_119 = arith.constant 0 : index
    %203 = vector.load %arg3[%c11_117, %c0_118, %c0_119] : memref<18x64x256xbf16, #tpu.memory_space<vmem>>, vector<1x64x256xbf16>
    %204 = vector.shape_cast %203 : vector<1x64x256xbf16> to vector<64x256xbf16>
    %cst_120 = arith.constant dense<0.000000e+00> : vector<1x64xf32>
    %205 = tpu.matmul %202, %204, %cst_120 {dimension_numbers = #tpu.dot_dimension_numbers<[1], [1], [0], [0], [0, 0, 1, 0], [], []>} : vector<1x256xbf16>, vector<64x256xbf16>, vector<1x64xf32> -> vector<1x64xf32>
    %206 = arith.addf %200, %205 : vector<1x64xf32>
    %207 = vector.extract_strided_slice %133 {offsets = [12, 0], sizes = [1, 256], strides = [1, 1]} : vector<18x256xf32> to vector<1x256xf32>
    %208 = arith.truncf %207 : vector<1x256xf32> to vector<1x256xbf16>
    %c12_121 = arith.constant 12 : index
    %c0_122 = arith.constant 0 : index
    %c0_123 = arith.constant 0 : index
    %209 = vector.load %arg3[%c12_121, %c0_122, %c0_123] : memref<18x64x256xbf16, #tpu.memory_space<vmem>>, vector<1x64x256xbf16>
    %210 = vector.shape_cast %209 : vector<1x64x256xbf16> to vector<64x256xbf16>
    %cst_124 = arith.constant dense<0.000000e+00> : vector<1x64xf32>
    %211 = tpu.matmul %208, %210, %cst_124 {dimension_numbers = #tpu.dot_dimension_numbers<[1], [1], [0], [0], [0, 0, 1, 0], [], []>} : vector<1x256xbf16>, vector<64x256xbf16>, vector<1x64xf32> -> vector<1x64xf32>
    %212 = arith.addf %206, %211 : vector<1x64xf32>
    %213 = vector.extract_strided_slice %133 {offsets = [13, 0], sizes = [1, 256], strides = [1, 1]} : vector<18x256xf32> to vector<1x256xf32>
    %214 = arith.truncf %213 : vector<1x256xf32> to vector<1x256xbf16>
    %c13_125 = arith.constant 13 : index
    %c0_126 = arith.constant 0 : index
    %c0_127 = arith.constant 0 : index
    %215 = vector.load %arg3[%c13_125, %c0_126, %c0_127] : memref<18x64x256xbf16, #tpu.memory_space<vmem>>, vector<1x64x256xbf16>
    %216 = vector.shape_cast %215 : vector<1x64x256xbf16> to vector<64x256xbf16>
    %cst_128 = arith.constant dense<0.000000e+00> : vector<1x64xf32>
    %217 = tpu.matmul %214, %216, %cst_128 {dimension_numbers = #tpu.dot_dimension_numbers<[1], [1], [0], [0], [0, 0, 1, 0], [], []>} : vector<1x256xbf16>, vector<64x256xbf16>, vector<1x64xf32> -> vector<1x64xf32>
    %218 = arith.addf %212, %217 : vector<1x64xf32>
    %219 = vector.extract_strided_slice %133 {offsets = [14, 0], sizes = [1, 256], strides = [1, 1]} : vector<18x256xf32> to vector<1x256xf32>
    %220 = arith.truncf %219 : vector<1x256xf32> to vector<1x256xbf16>
    %c14_129 = arith.constant 14 : index
    %c0_130 = arith.constant 0 : index
    %c0_131 = arith.constant 0 : index
    %221 = vector.load %arg3[%c14_129, %c0_130, %c0_131] : memref<18x64x256xbf16, #tpu.memory_space<vmem>>, vector<1x64x256xbf16>
    %222 = vector.shape_cast %221 : vector<1x64x256xbf16> to vector<64x256xbf16>
    %cst_132 = arith.constant dense<0.000000e+00> : vector<1x64xf32>
    %223 = tpu.matmul %220, %222, %cst_132 {dimension_numbers = #tpu.dot_dimension_numbers<[1], [1], [0], [0], [0, 0, 1, 0], [], []>} : vector<1x256xbf16>, vector<64x256xbf16>, vector<1x64xf32> -> vector<1x64xf32>
    %224 = arith.addf %218, %223 : vector<1x64xf32>
    %225 = vector.extract_strided_slice %133 {offsets = [15, 0], sizes = [1, 256], strides = [1, 1]} : vector<18x256xf32> to vector<1x256xf32>
    %226 = arith.truncf %225 : vector<1x256xf32> to vector<1x256xbf16>
    %c15_133 = arith.constant 15 : index
    %c0_134 = arith.constant 0 : index
    %c0_135 = arith.constant 0 : index
    %227 = vector.load %arg3[%c15_133, %c0_134, %c0_135] : memref<18x64x256xbf16, #tpu.memory_space<vmem>>, vector<1x64x256xbf16>
    %228 = vector.shape_cast %227 : vector<1x64x256xbf16> to vector<64x256xbf16>
    %cst_136 = arith.constant dense<0.000000e+00> : vector<1x64xf32>
    %229 = tpu.matmul %226, %228, %cst_136 {dimension_numbers = #tpu.dot_dimension_numbers<[1], [1], [0], [0], [0, 0, 1, 0], [], []>} : vector<1x256xbf16>, vector<64x256xbf16>, vector<1x64xf32> -> vector<1x64xf32>
    %230 = arith.addf %224, %229 : vector<1x64xf32>
    %231 = vector.extract_strided_slice %133 {offsets = [16, 0], sizes = [1, 256], strides = [1, 1]} : vector<18x256xf32> to vector<1x256xf32>
    %232 = arith.truncf %231 : vector<1x256xf32> to vector<1x256xbf16>
    %c16_137 = arith.constant 16 : index
    %c0_138 = arith.constant 0 : index
    %c0_139 = arith.constant 0 : index
    %233 = vector.load %arg3[%c16_137, %c0_138, %c0_139] : memref<18x64x256xbf16, #tpu.memory_space<vmem>>, vector<1x64x256xbf16>
    %234 = vector.shape_cast %233 : vector<1x64x256xbf16> to vector<64x256xbf16>
    %cst_140 = arith.constant dense<0.000000e+00> : vector<1x64xf32>
    %235 = tpu.matmul %232, %234, %cst_140 {dimension_numbers = #tpu.dot_dimension_numbers<[1], [1], [0], [0], [0, 0, 1, 0], [], []>} : vector<1x256xbf16>, vector<64x256xbf16>, vector<1x64xf32> -> vector<1x64xf32>
    %236 = arith.addf %230, %235 : vector<1x64xf32>
    %237 = vector.extract_strided_slice %133 {offsets = [17, 0], sizes = [1, 256], strides = [1, 1]} : vector<18x256xf32> to vector<1x256xf32>
    %238 = arith.truncf %237 : vector<1x256xf32> to vector<1x256xbf16>
    %c17_141 = arith.constant 17 : index
    %c0_142 = arith.constant 0 : index
    %c0_143 = arith.constant 0 : index
    %239 = vector.load %arg3[%c17_141, %c0_142, %c0_143] : memref<18x64x256xbf16, #tpu.memory_space<vmem>>, vector<1x64x256xbf16>
    %240 = vector.shape_cast %239 : vector<1x64x256xbf16> to vector<64x256xbf16>
    %cst_144 = arith.constant dense<0.000000e+00> : vector<1x64xf32>
    %241 = tpu.matmul %238, %240, %cst_144 {dimension_numbers = #tpu.dot_dimension_numbers<[1], [1], [0], [0], [0, 0, 1, 0], [], []>} : vector<1x256xbf16>, vector<64x256xbf16>, vector<1x64xf32> -> vector<1x64xf32>
    %242 = arith.addf %236, %241 : vector<1x64xf32>
    %cst_145 = arith.constant 0.000000e+00 : f32
    %243 = vector.broadcast %cst_145 : f32 to vector<1x64xf32>
    %244 = arith.maximumf %242, %243 : vector<1x64xf32>
    %245 = arith.truncf %244 : vector<1x64xf32> to vector<1x64xbf16>
    %c0_146 = arith.constant 0 : index
    %c0_147 = arith.constant 0 : index
    %246 = vector.load %arg5[%c0_146, %c0_147] : memref<10x64xbf16, #tpu.memory_space<vmem>>, vector<10x64xbf16>
    %cst_148 = arith.constant dense<0.000000e+00> : vector<1x10xf32>
    %247 = tpu.matmul %245, %246, %cst_148 {dimension_numbers = #tpu.dot_dimension_numbers<[1], [1], [0], [0], [0, 0, 1, 0], [], []>} : vector<1x64xbf16>, vector<10x64xbf16>, vector<1x10xf32> -> vector<1x10xf32>
    %c0_149 = arith.constant 0 : index
    %c0_150 = arith.constant 0 : index
    %248 = vector.load %arg6[%c0_149, %c0_150] : memref<1x10xf32, #tpu.memory_space<vmem>>, vector<1x10xf32>
    %249 = arith.addf %247, %248 : vector<1x10xf32>
    %c1_151 = arith.constant 1 : index
    %c0_152 = arith.constant 0 : index
    %250 = vector.load %arg7[%c1_151, %c0_152] : memref<2x10xf32, #tpu.memory_space<vmem>>, vector<1x10xf32>
    tpu.vector_store %arg7[%c1_151, %c0_152], %249 {strides = array<i32>} : memref<2x10xf32, #tpu.memory_space<vmem>>, vector<1x10xf32>,
    return
  }
}

</mosaic_0001>

<bundles_post_ra>
// kernel: simple_cnn_forward.1
= control target key start
LH: loop header
LB: loop body
LE: loop exit
PB: predicated region body
PF: predicated region fallthrough
CT: control target
= control target key end

     0   :  { %vm222_vm0 = vcmask 1044480   ;;  %vm223_vm1 = vcmask 1045504   ;;  %v5512_v8 = vmov 65535   ;;  %v5513_v16 = vmov 0   ;;  %s6862_s0 = inlined_call_operand.vmem [shape: bf16[27,2048], index: 0, kind: input, shape index: {}]   ;;  %s6863_s1 = inlined_call_operand.vmem [shape: bf16[18,27], index: 1, kind: input, shape index: {}]   ;;  %s6864_s2 = inlined_call_operand.vmem [shape: f32[18,1], index: 2, kind: input, shape index: {}]   ;;  %s6865_s3 = inlined_call_operand.vmem [shape: bf16[18,64,256], index: 3, kind: input, shape index: {}]   ;;  %s6866_s4 = inlined_call_operand.vmem [shape: f32[1,64], index: 4, kind: input, shape index: {}]   ;;  %s6867_s5 = inlined_call_operand.vmem [shape: bf16[10,64], index: 5, kind: input, shape index: {}]   ;;  %s6868_s6 = inlined_call_operand.vmem [shape: f32[1,10], index: 6, kind: input, shape index: {}]   ;;  %s6869_s7 = inlined_call_operand.hbm [shape: f32[2,10], index: 7, kind: output, shape index: {}]  }
   0x1   :  { %v31_v0 = vld [vmem:[%s6862_s0] sm:$0xff]  ;;  %v32_v2 = vld [vmem:[%s6862_s0 + $0x8] sm:$0xff]  ;;  %v224_v9 = vsel %vm222_vm0, 4294967295, %v5512_v8  ;;  %306 = vmatprep.mubr.bf16.mxu0 %v5513_v16  ;;  %357 = vmatprep.mubr.bf16.mxu1 %v5513_v16  ;;  %v33_v20 = vld [vmem:[%s6862_s0 + $0x10] sm:$0xff]  ;;  %vm215_vm2 = vcmask 220160  }
   0x2   :  { %v39_v1 = vld [vmem:[%s6862_s0 + $0x40] sm:$0xff]  ;;  %v40_v4 = vld [vmem:[%s6862_s0 + $0x48] sm:$0xff]  ;;  %v5575_v13 = vsel %vm223_vm1, %v224_v9, 0  ;;  %5050 = vset.pattern.permute.xlu0 %v5513_v16  ;;  %v41_v22 = vld [vmem:[%s6862_s0 + $0x50] sm:$0xff]  ;;  %5051 = vset.pattern.permute.xlu1 %v5513_v16 }
   0x3   :  { %v4280_v3 = vcombine.high %v31_v0, %v39_v1  ;;  %v4279_v5 = vcombine.low %v31_v0, %v39_v1  ;;  %v47_v6 = vld [vmem:[%s6862_s0 + $0x80] sm:$0xff]  ;;  %v4282_v10 = vcombine.high %v32_v2, %v40_v4  ;;  %v4281_v11 = vcombine.low %v32_v2, %v40_v4  ;;  %v48_v14 = vld [vmem:[%s6862_s0 + $0x88] sm:$0xff]  ;;  %v49_v26 = vld [vmem:[%s6862_s0 + $0x90] sm:$0xff] }
   0x4   :  { %v55_v7 = vld [vmem:[%s6862_s0 + $0xc0] sm:$0x33]  ;;  %v56_v15 = vld [vmem:[%s6862_s0 + $0xc8] sm:$0x33]  ;;  %v57_v27 = vld [vmem:[%s6862_s0 + $0xd0] sm:$0x33]  ;;  %v4284_v29 = vcombine.high %v33_v20, %v41_v22  ;;  %v4283_v37 = vcombine.low %v33_v20, %v41_v22 }
   0x5   :  { %v4296_v12 = vcombine.high %v47_v6, %v55_v7  ;;  %274 = vmatprep.subr.bf16.mxu0 %v4280_v3  ;;  %v4298_v17 = vcombine.high %v48_v14, %v56_v15  ;;  %v4295_v18 = vcombine.low %v47_v6, %v55_v7  ;;  %v4297_v19 = vcombine.low %v48_v14, %v56_v15  ;;  %v34_v28 = vld [vmem:[%s6862_s0 + $0x18] sm:$0xff]  ;;  %v5618_v34 = vld [vmem:[%s6863_s1] sm:$0xff]   ;;  %v36_v46 = vld [vmem:[%s6862_s0 + $0x28] sm:$0xff] }
   0x6   :  { %325 = vmatprep.subr.bf16.mxu1 %v4282_v10  ;;  %275 = vmatpush1.bf16.msra.mxu0 %v4279_v5  ;;  %v4300_v30 = vcombine.high %v49_v26, %v57_v27  ;;  %v42_v31 = vld [vmem:[%s6862_s0 + $0x58] sm:$0xff]  ;;  %v4299_v38 = vcombine.low %v49_v26, %v57_v27  ;;  %v35_v42 = vld [vmem:[%s6862_s0 + $0x20] sm:$0xff]  ;;  %v44_v47 = vld [vmem:[%s6862_s0 + $0x68] sm:$0xff] }
   0x7   :  { %v230_v21 = vand.u32 %v4296_v12, %v5575_v13  ;;  %326 = vmatpush1.bf16.msra.mxu1 %v4281_v11  ;;  %v236_v23 = vand.u32 %v4298_v17, %v5575_v13  ;;  %v227_v24 = vand.u32 %v4295_v18, %v5575_v13  ;;  %v233_v25 = vand.u32 %v4297_v19, %v5575_v13  ;;  %v50_v32 = vld [vmem:[%s6862_s0 + $0x98] sm:$0xff]  ;;  %v43_v43 = vld [vmem:[%s6862_s0 + $0x60] sm:$0xff]  ;;  %v5647_v49 = vld [vmem:[%s6863_s1 + $0x8] ss:$0 sps:$4 sm:$0x11]  }
   0x8   :  { %v58_v33 = vld [vmem:[%s6862_s0 + $0xd8] sm:$0x33]  ;;  %v4286_v35 = vcombine.high %v34_v28, %v42_v31  ;;  %v242_v39 = vand.u32 %v4300_v30, %v5575_v13  ;;  %v4285_v40 = vcombine.low %v34_v28, %v42_v31  ;;  %v239_v45 = vand.u32 %v4299_v38, %v5575_v13  ;;  %v718_v48 = vld [vmem:[%s6864_s2] sm:$0xff]  ;;  %v720_v51 = vld [vmem:[%s6864_s2 + $0x10] sm:$0x3] }
   0x9   :  { %276 = vmatprep.subr.bf16.mxu0 %v230_v21  ;;  %327 = vmatprep.subr.bf16.mxu1 %v236_v23  ;;  %v4302_v36 = vcombine.high %v50_v32, %v58_v33  ;;  %v4301_v41 = vcombine.low %v50_v32, %v58_v33  ;;  %v4288_v50 = vcombine.high %v35_v42, %v43_v43  ;;  %v719_v54 = vld [vmem:[%s6864_s2 + $0x8] sm:$0xff]  ;;  %v51_v55 = vld [vmem:[%s6862_s0 + $0xa0] sm:$0xff]  ;;  %v37_v63 = vld [vmem:[%s6862_s0 + $0x30] sm:$0xff] }
   0xa   :  { %277 = vmatpush1.bf16.msra.mxu0 %v227_v24  ;;  %v4290_v53 = vcombine.high %v36_v46, %v44_v47  ;;  %723 = vperm.xlu0 %5050, %v718_v48   ;;  %v59_v56 = vld [vmem:[%s6862_s0 + $0xe0] sm:$0x33]  ;;  %v52_v57 = vld [vmem:[%s6862_s0 + $0xa8] sm:$0xff]  ;;  %v4287_v61 = vcombine.low %v35_v42, %v43_v43  ;;  %v45_v0 = vld [vmem:[%s6862_s0 + $0x70] sm:$0xff]  ;;  %v4289_v2 = vcombine.low %v36_v46, %v44_v47 }
   0xb   :  { %328 = vmatpush1.bf16.msra.mxu1 %v233_v25  ;;  %376 = vmatprep.subr.bf16.mxu0 %v4284_v29  ;;  %v248_v44 = vand.u32 %v4302_v36, %v5575_v13  ;;  %v245_v52 = vand.u32 %v4301_v41, %v5575_v13  ;;  %v60_v58 = vld [vmem:[%s6862_s0 + $0xe8] sm:$0x33]  ;;  %v4304_v59 = vcombine.high %v51_v55, %v59_v56  ;;  %v38_v4 = vld [vmem:[%s6862_s0 + $0x38] sm:$0xff]  ;;  %v53_v11 = vld [vmem:[%s6862_s0 + $0xb0] sm:$0xff] }
   0xc   :  { %427 = vmatprep.subr.bf16.mxu1 %v4286_v35  ;;  %733 = vperm.xlu1 %5051, %v720_v51   ;;  %v4306_v60 = vcombine.high %v52_v57, %v60_v58  ;;  %v4303_v62 = vcombine.low %v51_v55, %v59_v56  ;;  %v4305_v3 = vcombine.low %v52_v57, %v60_v58  ;;  %v46_v5 = vld [vmem:[%s6862_s0 + $0x78] sm:$0xff]  ;;  %v61_v12 = vld [vmem:[%s6862_s0 + $0xf0] sm:$0x33] }
   0xd   :  { %4311 = vmatmul.mubr.msk.bf16.vlgmr.msra.gmra.mrb[0].mxu0 %vm215_vm2, %v5618_v34  ;;  %v254_v1 = vand.u32 %v4304_v59, %v5575_v13  ;;  %v4292_v8 = vcombine.high %v37_v63, %v45_v0  ;;  %v4294_v10 = vcombine.high %v38_v4, %v46_v5  ;;  %v54_v14 = vld [vmem:[%s6862_s0 + $0xb8] sm:$0xff]  ;;  %v4308_v17 = vcombine.high %v53_v11, %v61_v12 }
   0xe   :  { %4313 = vmatmul.mubr.msk.bf16.vlgmr.msra.gmra.mrb[0].mxu1 %vm215_vm2, %v5618_v34  ;;  %377 = vmatpush1.bf16.msra.mxu0 %v4283_v37  ;;  %v260_v6 = vand.u32 %v4306_v60, %v5575_v13  ;;  %v251_v7 = vand.u32 %v4303_v62, %v5575_v13  ;;  %v257_v9 = vand.u32 %v4305_v3, %v5575_v13  ;;  %v62_v15 = vld [vmem:[%s6862_s0 + $0xf8] sm:$0x33] }
   0xf   :  { %316 = vmatprep.mubr.bf16.mxu0 %v5513_v16  ;;  %367 = vmatprep.mubr.bf16.mxu1 %v5513_v16  ;;  %v4310_v18 = vcombine.high %v54_v14, %v62_v15  ;;  %v4291_v19 = vcombine.low %v37_v63, %v45_v0  ;;  %v4307_v20 = vcombine.low %v53_v11, %v61_v12 }
  0x10   :  { %378 = vmatprep.subr.bf16.mxu0 %v242_v39  ;;  %428 = vmatpush1.bf16.msra.mxu1 %v4285_v40  ;;  %v266_v21 = vand.u32 %v4308_v17, %v5575_v13  ;;  %v4293_v22 = vcombine.low %v38_v4, %v46_v5  ;;  %v4309_v23 = vcombine.low %v54_v14, %v62_v15 }
  0x11   :  { %429 = vmatprep.subr.bf16.mxu1 %v248_v44  ;;  %728 = vperm.xlu0 %5050, %v719_v54   ;;  %v272_v24 = vand.u32 %v4310_v18, %v5575_v13  ;;  %v263_v25 = vand.u32 %v4307_v20, %v5575_v13 }
  0x12   :  { %379 = vmatpush1.bf16.msra.mxu0 %v239_v45  ;;  %v269_v26 = vand.u32 %v4309_v23, %v5575_v13 }
  0x13   :  { %478 = vmatprep.subr.bf16.mxu0 %v4288_v50 }
  0x14   :  { %430 = vmatpush1.bf16.msra.mxu1 %v245_v52 }
  0x15   :  { %4312 = vmatmul.mubr.msk.bf16.gmra.mrb[4].mxu0 %vm215_vm2, %v5647_v49  ;;  %529 = vmatprep.subr.bf16.mxu1 %v4290_v53 }
  0x16   :  { %4314 = vmatmul.mubr.msk.bf16.gmra.mrb[4].mxu1 %vm215_vm2, %v5647_v49  ;;  %408 = vmatprep.mubr.bf16.mxu0 %v5513_v16 }
  0x17   :  { %459 = vmatprep.mubr.bf16.mxu1 %v5513_v16 }
  0x1d   :  { %4315 = vmatmul.mubr.msk.bf16.vlgmr.msra.gmra.mrb[8].mxu0 %vm215_vm2, %v5618_v34 }
  0x1e   :  { %4317 = vmatmul.mubr.msk.bf16.vlgmr.msra.gmra.mrb[8].mxu1 %vm215_vm2, %v5618_v34  ;;  %479 = vmatpush1.bf16.msra.mxu0 %v4287_v61 }
  0x1f   :  { %418 = vmatprep.mubr.bf16.mxu0 %v5513_v16  ;;  %469 = vmatprep.mubr.bf16.mxu1 %v5513_v16 }
  0x20   :  { %480 = vmatprep.subr.bf16.mxu0 %v254_v1  ;;  %530 = vmatpush1.bf16.msra.mxu1 %v4289_v2 }
  0x21   :  { %531 = vmatprep.subr.bf16.mxu1 %v260_v6 }
  0x22   :  { %481 = vmatpush1.bf16.msra.mxu0 %v251_v7 }
  0x23   :  { %580 = vmatprep.subr.bf16.mxu0 %v4292_v8 }
  0x24   :  { %532 = vmatpush1.bf16.msra.mxu1 %v257_v9 }
  0x25   :  { %4316 = vmatmul.mubr.msk.bf16.gmra.mrb[12].mxu0 %vm215_vm2, %v5647_v49  ;;  %631 = vmatprep.subr.bf16.mxu1 %v4294_v10 }
  0x26   :  { %4318 = vmatmul.mubr.msk.bf16.gmra.mrb[12].mxu1 %vm215_vm2, %v5647_v49  ;;  %510 = vmatprep.mubr.bf16.mxu0 %v5513_v16 }
  0x27   :  { %561 = vmatprep.mubr.bf16.mxu1 %v5513_v16 }
  0x2d   :  { %4319 = vmatmul.mubr.msk.bf16.vlgmr.msra.gmra.mrb[16].mxu0 %vm215_vm2, %v5618_v34 }
  0x2e   :  { %4321 = vmatmul.mubr.msk.bf16.vlgmr.msra.gmra.mrb[16].mxu1 %vm215_vm2, %v5618_v34  ;;  %581 = vmatpush1.bf16.msra.mxu0 %v4291_v19 }
  0x2f   :  { %520 = vmatprep.mubr.bf16.mxu0 %v5513_v16  ;;  %571 = vmatprep.mubr.bf16.mxu1 %v5513_v16 }
  0x30   :  { %582 = vmatprep.subr.bf16.mxu0 %v266_v21  ;;  %632 = vmatpush1.bf16.msra.mxu1 %v4293_v22 }
  0x31   :  { %633 = vmatprep.subr.bf16.mxu1 %v272_v24 }
  0x32   :  { %583 = vmatpush1.bf16.msra.mxu0 %v263_v25 }
  0x34   :  { %634 = vmatpush1.bf16.msra.mxu1 %v269_v26 }
  0x35   :  { %4320 = vmatmul.mubr.msk.bf16.gmra.mrb[20].mxu0 %vm215_vm2, %v5647_v49 }
  0x36   :  { %4322 = vmatmul.mubr.msk.bf16.gmra.mrb[20].mxu1 %vm215_vm2, %v5647_v49  ;;  %612 = vmatprep.mubr.bf16.mxu0 %v5513_v16 }
  0x37   :  { %663 = vmatprep.mubr.bf16.mxu1 %v5513_v16 }
  0x3d   :  { %4323 = vmatmul.mubr.msk.bf16.vlgmr.msra.gmra.mrb[24].mxu0 %vm215_vm2, %v5618_v34 }
  0x3e   :  { %4325 = vmatmul.mubr.msk.bf16.vlgmr.msra.gmra.mrb[24].mxu1 %vm215_vm2, %v5618_v34  ;;  %622 = vmatprep.mubr.bf16.mxu0 %v5513_v16 }
  0x3f   :  { %673 = vmatprep.mubr.bf16.mxu1 %v5513_v16 }
  0x45   :  { %4324 = vmatmul.mubr.msk.bf16.gmra.mrb[28].mxu0 %vm215_vm2, %v5647_v49 }
  0x46   :  { %4326 = vmatmul.mubr.msk.bf16.gmra.mrb[28].mxu1 %vm215_vm2, %v5647_v49 }
  0x47   :  { %12 = vsyncpa [#allocation3], 0  ;;  %v5054_v13 = vld [vmem:[%s6865_s3] ss:$8 sps:$4 sm:$0xff]   ;;  %v5056_v27 = vld [vmem:[%s6865_s3 + $0x4] ss:$8 sps:$4 sm:$0xff]  }
  0x48   :  { %811 = vmatprep.subr.bf16.mxu0 %v5056_v27  ;;  %v5057_v16 = vld [vmem:[%s6865_s3 + $0x10] ss:$8 sps:$4 sm:$0xff]   ;;  %v5059_v28 = vld [vmem:[%s6865_s3 + $0x14] ss:$8 sps:$4 sm:$0xff]   ;;  %v5060_v29 = vld [vmem:[%s6865_s3 + $0x20] ss:$8 sps:$4 sm:$0xff]  }
  0x49   :  { %812 = vmatpush1.bf16.xpose.msra.mxu0 %v5054_v13  ;;  %v5062_v30 = vld [vmem:[%s6865_s3 + $0x24] ss:$8 sps:$4 sm:$0xff]   ;;  %v5065_v31 = vld [vmem:[%s6865_s3 + $0x34] ss:$8 sps:$4 sm:$0xff]   ;;  %v5063_v32 = vld [vmem:[%s6865_s3 + $0x30] ss:$8 sps:$4 sm:$0xff]  }
  0x4a   :  { %813 = vmatprep.subr.bf16.mxu0 %v5059_v28  ;;  %v5068_v33 = vld [vmem:[%s6865_s3 + $0x44] ss:$8 sps:$4 sm:$0xff]   ;;  %vm2472_vm3 = vcmask 523264   ;;  %vm5515_vm4 = vmmov 0   ;;  %vm2519_vm5 = vcmask 73728  }
  0x51   :  { %814 = vmatpush1.bf16.xpose.msra.mxu0 %v5057_v16 }
  0x52   :  { %815 = vmatprep.subr.bf16.mxu0 %v5062_v30 }
  0x59   :  { %816 = vmatpush1.bf16.xpose.msra.mxu0 %v5060_v29 }
  0x5a   :  { %817 = vmatprep.subr.bf16.mxu0 %v5065_v31 }
  0x61   :  { %818 = vmatpush1.bf16.xpose.msra.mxu0 %v5063_v32 }
  0x62   :  { %909 = vmatprep.subr.bf16.mxu0 %v5068_v33 }
  0x89   :  { %v5819_v30 = vpop.permute.xlu0 %723 }
  0xe0   :  { %v5767_v34 = vpop.f32.mrb[0].mxu0 }
  0xe1   :  { %v5769_v35 = vpop.f32.mrb[1].mxu0  ;;  %v5771_v36 = vpop.f32.mrb[0].mxu1 }
  0xe2   :  { %v5773_v37 = vpop.f32.mrb[2].mxu0  ;;  %v5775_v38 = vpop.f32.mrb[1].mxu1 }
  0xe3   :  { %v5777_v39 = vpop.f32.mrb[3].mxu0  ;;  %v5779_v40 = vpop.f32.mrb[2].mxu1 }
  0xe4   :  { %v5781_v41 = vpop.f32.mrb[3].mxu1 }
  0xe8   :  { %v5783_v42 = vpop.f32.mrb[4].mxu0 }
  0xe9   :  { %v5785_v43 = vpop.f32.mrb[5].mxu0  ;;  %v5787_v44 = vpop.f32.mrb[4].mxu1 }
  0xea   :  { %v322_v45 = vpop.f32.mrb[6].mxu0  ;;  %v5789_v46 = vpop.f32.mrb[5].mxu1 }
  0xeb   :  { %v323_v47 = vpop.f32.mrb[7].mxu0  ;;  %v373_v48 = vpop.f32.mrb[6].mxu1 }
  0xec   :  { %v374_v49 = vpop.f32.mrb[7].mxu1 }
  0xf0   :  { %v410_v50 = vpop.f32.mrb[8].mxu0 }
  0xf1   :  { %v682_v51 = vmax.f32 %v5767_v34, %v410_v50  ;;  %v412_v52 = vpop.f32.mrb[9].mxu0  ;;  %v461_v53 = vpop.f32.mrb[8].mxu1 }
  0xf2   :  { %v683_v54 = vmax.f32 %v5769_v35, %v412_v52  ;;  %v414_v55 = vpop.f32.mrb[10].mxu0  ;;  %v684_v56 = vmax.f32 %v5771_v36, %v461_v53  ;;  %v463_v57 = vpop.f32.mrb[9].mxu1 }
  0xf3   :  { %v686_v58 = vmax.f32 %v5773_v37, %v414_v55  ;;  %v416_v59 = vpop.f32.mrb[11].mxu0  ;;  %v685_v60 = vmax.f32 %v5775_v38, %v463_v57  ;;  %v465_v61 = vpop.f32.mrb[10].mxu1 }
  0xf4   :  { %v687_v62 = vmax.f32 %v5777_v39, %v416_v59  ;;  %v688_v63 = vmax.f32 %v5779_v40, %v465_v61  ;;  %v467_v0 = vpop.f32.mrb[11].mxu1 }
  0xf5   :  { %v689_v1 = vmax.f32 %v5781_v41, %v467_v0  ;;  %v5828_v0 = vpop.permute.xlu0 %728 }
  0xf8   :  { %v5799_v2 = vpop.f32.mrb[12].mxu0 }
  0xf9   :  { %v690_v3 = vmax.f32 %v5783_v42, %v5799_v2  ;;  %v5803_v4 = vpop.f32.mrb[13].mxu0  ;;  %v5805_v5 = vpop.f32.mrb[12].mxu1  ;;  %v5074_v42 = vld [vmem:[%s6865_s3 + $0x64] ss:$8 sps:$4 sm:$0xff]   ;;  %v5077_v2 = vld [vmem:[%s6865_s3 + $0x74] ss:$8 sps:$4 sm:$0xff]  }
  0xfa   :  { %v691_v6 = vmax.f32 %v5785_v43, %v5803_v4  ;;  %v424_v7 = vpop.f32.mrb[14].mxu0  ;;  %v692_v8 = vmax.f32 %v5787_v44, %v5805_v5  ;;  %v5811_v9 = vpop.f32.mrb[13].mxu1  ;;  %v5072_v43 = vld [vmem:[%s6865_s3 + $0x60] ss:$8 sps:$4 sm:$0xff]   ;;  %v5080_v4 = vld [vmem:[%s6865_s3 + $0x84] ss:$8 sps:$4 sm:$0xff]  }
  0xfb   :  { %v425_v10 = vpop.f32.mrb[15].mxu0  ;;  %v693_v11 = vmax.f32 %v5789_v46, %v5811_v9  ;;  %v475_v12 = vpop.f32.mrb[14].mxu1  ;;  %v5210_v44 = vld [vmem:[%s6865_s3 + $0x340] ss:$8 sps:$4 sm:$0xff]   ;;  %v5213_v9 = vld [vmem:[%s6865_s3 + $0x350] ss:$8 sps:$4 sm:$0xff]  }
  0xfc   :  { %v476_v14 = vpop.f32.mrb[15].mxu1 }
 0x100   :  { %v512_v15 = vpop.f32.mrb[16].mxu0 }
 0x101   :  { %v514_v17 = vpop.f32.mrb[17].mxu0  ;;  %v563_v18 = vpop.f32.mrb[16].mxu1 }
 0x102   :  { %v516_v19 = vpop.f32.mrb[18].mxu0  ;;  %v565_v20 = vpop.f32.mrb[17].mxu1 }
 0x103   :  { %v518_v21 = vpop.f32.mrb[19].mxu0  ;;  %v567_v22 = vpop.f32.mrb[18].mxu1 }
 0x104   :  { %v569_v23 = vpop.f32.mrb[19].mxu1 }
 0x108   :  { %v522_v24 = vpop.f32.mrb[20].mxu0 }
 0x109   :  { %v524_v25 = vpop.f32.mrb[21].mxu0  ;;  %v5815_v26 = vpop.f32.mrb[20].mxu1 }
 0x10a   :  { %v526_v13 = vpop.f32.mrb[22].mxu0  ;;  %v5817_v27 = vpop.f32.mrb[21].mxu1 }
 0x10b   :  { %v527_v16 = vpop.f32.mrb[23].mxu0  ;;  %v577_v28 = vpop.f32.mrb[22].mxu1 }
 0x10c   :  { %v578_v29 = vpop.f32.mrb[23].mxu1  ;;  %v5083_v16 = vld [vmem:[%s6865_s3 + $0x94] ss:$8 sps:$4 sm:$0xff]  }
 0x10d   :  { %v5081_v29 = vld [vmem:[%s6865_s3 + $0x90] ss:$8 sps:$4 sm:$0xff]  }
 0x110   :  { %v614_v31 = vpop.f32.mrb[24].mxu0 }
 0x111   :  { %v694_v32 = vmax.f32 %v512_v15, %v614_v31  ;;  %v665_v33 = vpop.f32.mrb[24].mxu1  ;;  %v616_v34 = vpop.f32.mrb[25].mxu0  ;;  %v5086_v31 = vld [vmem:[%s6865_s3 + $0xa4] ss:$8 sps:$4 sm:$0xff]  }
 0x112   :  { %v696_v35 = vmax.f32 %v563_v18, %v665_v33  ;;  %v695_v36 = vmax.f32 %v514_v17, %v616_v34  ;;  %v667_v37 = vpop.f32.mrb[25].mxu1  ;;  %v618_v38 = vpop.f32.mrb[26].mxu0  ;;  %v5066_v18 = vld [vmem:[%s6865_s3 + $0x40] ss:$8 sps:$4 sm:$0xff]   ;;  %v5089_v33 = vld [vmem:[%s6865_s3 + $0xb4] ss:$8 sps:$4 sm:$0xff]  }
 0x113   :  { %v706_v39 = vmax.f32 %v682_v51, %v694_v32  ;;  %v697_v40 = vmax.f32 %v565_v20, %v667_v37  ;;  %v698_v41 = vmax.f32 %v516_v19, %v618_v38  ;;  %v669_v45 = vpop.f32.mrb[26].mxu1  ;;  %v620_v47 = vpop.f32.mrb[27].mxu0  ;;  %v5084_v32 = vld [vmem:[%s6865_s3 + $0xa0] ss:$8 sps:$4 sm:$0xff]   ;;  %v5087_v34 = vld [vmem:[%s6865_s3 + $0xb0] ss:$8 sps:$4 sm:$0xff]  }
 0x114   :  { %v5821_v48 = vmax.f32 %v684_v56, %v696_v35  ;;  %v707_v49 = vmax.f32 %v683_v54, %v695_v36  ;;  %v700_v50 = vmax.f32 %v567_v22, %v669_v45  ;;  %v699_v52 = vmax.f32 %v518_v21, %v620_v47  ;;  %v671_v53 = vpop.f32.mrb[27].mxu1  ;;  %v5092_v35 = vld [vmem:[%s6865_s3 + $0xc4] ss:$8 sps:$4 sm:$0xff]   ;;  %v5090_v36 = vld [vmem:[%s6865_s3 + $0xc0] ss:$8 sps:$4 sm:$0xff]  }
 0x115   :  { %v5823_v55 = vmax.f32 %v685_v60, %v697_v40  ;;  %v736_v57 = vadd.f32 %v5819_v30, %v706_v39  ;;  %v5826_v59 = vmax.f32 %v686_v58, %v698_v41  ;;  %v701_v61 = vmax.f32 %v569_v23, %v671_v53  ;;  %v5095_v38 = vld [vmem:[%s6865_s3 + $0xd4] ss:$8 sps:$4 sm:$0xff]   ;;  %v5093_v40 = vld [vmem:[%s6865_s3 + $0xd0] ss:$8 sps:$4 sm:$0xff]   ;;  %v5098_v41 = vld [vmem:[%s6865_s3 + $0xe4] ss:$8 sps:$4 sm:$0xff]  }
 0x116   :  { %v737_v51 = vadd.f32 %v5819_v30, %v707_v49  ;;  %v712_v7 = vmax.f32 %v688_v63, %v700_v50  ;;  %v5831_v10 = vmax.f32 %v687_v62, %v699_v52  ;;  %v5096_v45 = vld [vmem:[%s6865_s3 + $0xe0] ss:$8 sps:$4 sm:$0xff]   ;;  %v5101_v47 = vld [vmem:[%s6865_s3 + $0xf4] ss:$8 sps:$4 sm:$0xff]   ;;  %v5099_v49 = vld [vmem:[%s6865_s3 + $0xf0] ss:$8 sps:$4 sm:$0xff]  }
 0x117   :  { %v748_v56 = vmax.f32 %v736_v57, 0.0  ;;  %v713_v12 = vmax.f32 %v689_v1, %v701_v61  ;;  %v5071_v1 = vld [vmem:[%s6865_s3 + $0x54] ss:$8 sps:$4 sm:$0xff]   ;;  %v5104_v50 = vld [vmem:[%s6865_s3 + $0x104] ss:$8 sps:$4 sm:$0xff]  }
 0x118   :  { %v749_v54 = vmax.f32 %v737_v51, 0.0  ;;  %v5834_v14 = vadd.f32 %v5828_v0, %v712_v7  ;;  %v624_v60 = vpop.f32.mrb[28].mxu0  ;;  %v5102_v52 = vld [vmem:[%s6865_s3 + $0x100] ss:$8 sps:$4 sm:$0xff]   ;;  %v5107_v57 = vld [vmem:[%s6865_s3 + $0x114] ss:$8 sps:$4 sm:$0xff]  }
 0x119   :  { %v5837_v15 = vadd.f32 %v5828_v0, %v713_v12  ;;  %v626_v58 = vpop.f32.mrb[29].mxu0  ;;  %v5844_v62 = vpack.c.bf16 %v748_v56, %v748_v56  ;;  %v702_v19 = vmax.f32 %v522_v24, %v624_v60  ;;  %v5105_v51 = vld [vmem:[%s6865_s3 + $0x110] ss:$8 sps:$4 sm:$0xff]   ;;  %v5110_v7 = vld [vmem:[%s6865_s3 + $0x124] ss:$8 sps:$4 sm:$0xff]  }
 0x11a   :  { %v5839_v17 = vpack.c.bf16 %v749_v54, %v749_v54  ;;  %v628_v63 = vpop.f32.mrb[30].mxu0  ;;  %v703_v21 = vmax.f32 %v524_v25, %v626_v58  ;;  %v5069_v25 = vld [vmem:[%s6865_s3 + $0x50] ss:$8 sps:$4 sm:$0xff]   ;;  %v5108_v56 = vld [vmem:[%s6865_s3 + $0x120] ss:$8 sps:$4 sm:$0xff]  }
 0x11b   :  { %v629_v20 = vpop.f32.mrb[31].mxu0  ;;  %v5856_v23 = vmax.f32 %v690_v3, %v702_v19  ;;  %v5075_v3 = vld [vmem:[%s6865_s3 + $0x70] ss:$8 sps:$4 sm:$0xff]   ;;  %v5887_v13 = vshrl.u32 %v5844_v62, 16  ;;  %v961_v37 = vrot.slane %v5844_v62, 1 }
 0x11c   :  { %843 = vmatprep.mubr.bf16.mxu0 %v5839_v17  ;;  %v5851_v22 = vshrl.u32 %v5839_v17, 16  ;;  %v5862_v24 = vmax.f32 %v691_v6, %v703_v21  ;;  %v5078_v6 = vld [vmem:[%s6865_s3 + $0x80] ss:$8 sps:$4 sm:$0xff]   ;;  %v962_v28 = vrot.slane %v5839_v17, 1  ;;  %v1150_v61 = vrot.slane %v5839_v17, 2 }
 0x11d   :  { %844 = vmatmul.mubr.bf16.vlgmr.msra.gmra.mrb[32].mxu0 %v5844_v62  ;;  %v1055_v53 = vrot.slane %v5887_v13, 1  ;;  %v5113_v12 = vld [vmem:[%s6865_s3 + $0x134] ss:$8 sps:$4 sm:$0xff]   ;;  %v5111_v54 = vld [vmem:[%s6865_s3 + $0x130] ss:$8 sps:$4 sm:$0xff]  }
 0x11e   :  { %910 = vmatpush1.bf16.xpose.msra.mxu0 %v5066_v18  ;;  %941 = vmatprep.mubr.bf16.mxu0 %v5851_v22  ;;  %v1056_v39 = vrot.slane %v5851_v22, 1  ;;  %v5116_v60 = vld [vmem:[%s6865_s3 + $0x144] ss:$8 sps:$4 sm:$0xff]   ;;  %v5114_v58 = vld [vmem:[%s6865_s3 + $0x140] ss:$8 sps:$4 sm:$0xff]   ;;  %v1149_v18 = vrot.slane %v5844_v62, 2 }
 0x11f   :  { %911 = vmatprep.subr.bf16.mxu0 %v5071_v1  ;;  %v5119_v63 = vld [vmem:[%s6865_s3 + $0x154] ss:$8 sps:$4 sm:$0xff]   ;;  %v1244_v19 = vrot.slane %v5851_v22, 2  ;;  %v5117_v1 = vld [vmem:[%s6865_s3 + $0x150] ss:$8 sps:$4 sm:$0xff]  }
 0x120   :  { %v5122_v20 = vld [vmem:[%s6865_s3 + $0x164] ss:$8 sps:$4 sm:$0xff]   ;;  %v5120_v21 = vld [vmem:[%s6865_s3 + $0x160] ss:$8 sps:$4 sm:$0xff]  }
 0x126   :  { %912 = vmatpush1.bf16.xpose.msra.mxu0 %v5069_v25  ;;  %v5125_v25 = vld [vmem:[%s6865_s3 + $0x174] ss:$8 sps:$4 sm:$0xff]  }
 0x127   :  { %913 = vmatprep.subr.bf16.mxu0 %v5074_v42  ;;  %v5123_v42 = vld [vmem:[%s6865_s3 + $0x170] ss:$8 sps:$4 sm:$0xff]  }
 0x12e   :  { %914 = vmatpush1.bf16.xpose.msra.mxu0 %v5072_v43  ;;  %v5128_v43 = vld [vmem:[%s6865_s3 + $0x184] ss:$8 sps:$4 sm:$0xff]  }
 0x12f   :  { %915 = vmatprep.subr.bf16.mxu0 %v5077_v2  ;;  %v5126_v2 = vld [vmem:[%s6865_s3 + $0x180] ss:$8 sps:$4 sm:$0xff]  }
 0x136   :  { %916 = vmatpush1.bf16.xpose.msra.mxu0 %v5075_v3  ;;  %v1243_v3 = vrot.slane %v5887_v13, 2 }
 0x137   :  { %1005 = vmatprep.subr.bf16.mxu0 %v5080_v4  ;;  %v5131_v4 = vld [vmem:[%s6865_s3 + $0x194] ss:$8 sps:$4 sm:$0xff]  }
 0x13d   :  { %942 = vmatmul.mubr.bf16.vlgmr.msra.gmra.mrb[32].mxu0 %v5887_v13 }
 0x13e   :  { %1006 = vmatpush1.bf16.xpose.msra.mxu0 %v5078_v6  ;;  %1037 = vmatprep.mubr.bf16.mxu0 %v962_v28  ;;  %v1338_v6 = vrot.slane %v5839_v17, 3  ;;  %v5134_v28 = vld [vmem:[%s6865_s3 + $0x1a4] ss:$8 sps:$4 sm:$0xff]   ;;  %v5137_v17 = vld [vmem:[%s6865_s3 + $0x1b4] ss:$8 sps:$4 sm:$0xff]  }
 0x13f   :  { %1007 = vmatprep.subr.bf16.mxu0 %v5083_v16  ;;  %v5129_v16 = vld [vmem:[%s6865_s3 + $0x190] ss:$8 sps:$4 sm:$0xff]  }
 0x146   :  { %1008 = vmatpush1.bf16.xpose.msra.mxu0 %v5081_v29  ;;  %v5132_v29 = vld [vmem:[%s6865_s3 + $0x1a0] ss:$8 sps:$4 sm:$0xff]  }
 0x147   :  { %1009 = vmatprep.subr.bf16.mxu0 %v5086_v31  ;;  %v5135_v31 = vld [vmem:[%s6865_s3 + $0x1b0] ss:$8 sps:$4 sm:$0xff]  }
 0x14e   :  { %1010 = vmatpush1.bf16.xpose.msra.mxu0 %v5084_v32  ;;  %v5140_v32 = vld [vmem:[%s6865_s3 + $0x1c4] ss:$8 sps:$4 sm:$0xff]  }
 0x14f   :  { %1011 = vmatprep.subr.bf16.mxu0 %v5089_v33  ;;  %v5138_v33 = vld [vmem:[%s6865_s3 + $0x1c0] ss:$8 sps:$4 sm:$0xff]  }
 0x156   :  { %1012 = vmatpush1.bf16.xpose.msra.mxu0 %v5087_v34  ;;  %v1337_v34 = vrot.slane %v5844_v62, 3  ;;  %v5144_v62 = vld [vmem:[%s6865_s3 + $0x1e0] ss:$8 sps:$4 sm:$0xff]  }
 0x157   :  { %1099 = vmatprep.subr.bf16.mxu0 %v5092_v35  ;;  %v5143_v35 = vld [vmem:[%s6865_s3 + $0x1d4] ss:$8 sps:$4 sm:$0xff]  }
 0x15d   :  { %1038 = vmatmul.mubr.bf16.vlgmr.msra.gmra.mrb[32].mxu0 %v961_v37  ;;  %v5141_v37 = vld [vmem:[%s6865_s3 + $0x1d0] ss:$8 sps:$4 sm:$0xff]  }
 0x15e   :  { %1100 = vmatpush1.bf16.xpose.msra.mxu0 %v5090_v36  ;;  %1131 = vmatprep.mubr.bf16.mxu0 %v1056_v39  ;;  %v1432_v36 = vrot.slane %v5851_v22, 3  ;;  %v5149_v22 = vld [vmem:[%s6865_s3 + $0x1f4] ss:$8 sps:$4 sm:$0xff]   ;;  %v5147_v39 = vld [vmem:[%s6865_s3 + $0x1f0] ss:$8 sps:$4 sm:$0xff]  }
 0x15f   :  { %1101 = vmatprep.subr.bf16.mxu0 %v5095_v38  ;;  %v5146_v38 = vld [vmem:[%s6865_s3 + $0x1e4] ss:$8 sps:$4 sm:$0xff]  }
 0x166   :  { %1102 = vmatpush1.bf16.xpose.msra.mxu0 %v5093_v40  ;;  %v5152_v40 = vld [vmem:[%s6865_s3 + $0x204] ss:$8 sps:$4 sm:$0xff]  }
 0x167   :  { %1103 = vmatprep.subr.bf16.mxu0 %v5098_v41  ;;  %v741_v41 = vadd.f32 %v5828_v0, %v5831_v10  ;;  %v5153_v10 = vld [vmem:[%s6865_s3 + $0x210] ss:$8 sps:$4 sm:$0xff]  }
 0x16e   :  { %1104 = vmatpush1.bf16.xpose.msra.mxu0 %v5096_v45  ;;  %v753_v45 = vmax.f32 %v741_v41, 0.0  ;;  %v5206_v41 = vld [vmem:[%s6865_s3 + $0x324] ss:$8 sps:$4 sm:$0xff]  }
 0x16f   :  { %1105 = vmatprep.subr.bf16.mxu0 %v5101_v47  ;;  %v5150_v47 = vld [vmem:[%s6865_s3 + $0x200] ss:$8 sps:$4 sm:$0xff]  }
 0x176   :  { %1106 = vmatpush1.bf16.xpose.msra.mxu0 %v5099_v49  ;;  %v1431_v49 = vrot.slane %v5887_v13, 3  ;;  %v5156_v13 = vld [vmem:[%s6865_s3 + $0x220] ss:$8 sps:$4 sm:$0xff]  }
 0x177   :  { %1193 = vmatprep.subr.bf16.mxu0 %v5104_v50  ;;  %v5155_v50 = vld [vmem:[%s6865_s3 + $0x214] ss:$8 sps:$4 sm:$0xff]  }
 0x17d   :  { %1132 = vmatmul.mubr.bf16.vlgmr.msra.gmra.mrb[32].mxu0 %v1055_v53  ;;  %v5158_v53 = vld [vmem:[%s6865_s3 + $0x224] ss:$8 sps:$4 sm:$0xff]  }
 0x17e   :  { %1194 = vmatpush1.bf16.xpose.msra.mxu0 %v5102_v52  ;;  %1225 = vmatprep.mubr.bf16.mxu0 %v1150_v61  ;;  %v6051_v52 = vpack.c.bf16 %v753_v45, %v753_v45  ;;  %v5159_v61 = vld [vmem:[%s6865_s3 + $0x230] ss:$8 sps:$4 sm:$0xff]   ;;  %v5204_v45 = vld [vmem:[%s6865_s3 + $0x320] ss:$8 sps:$4 sm:$0xff]  }
 0x17f   :  { %1195 = vmatprep.subr.bf16.mxu0 %v5107_v57  ;;  %v5161_v57 = vld [vmem:[%s6865_s3 + $0x234] ss:$8 sps:$4 sm:$0xff]  }
 0x186   :  { %1196 = vmatpush1.bf16.xpose.msra.mxu0 %v5105_v51  ;;  %v740_v51 = vadd.f32 %v5828_v0, %v5826_v59  ;;  %v5165_v59 = vld [vmem:[%s6865_s3 + $0x250] ss:$8 sps:$4 sm:$0xff]   ;;  %v5170_v0 = vld [vmem:[%s6865_s3 + $0x264] ss:$8 sps:$4 sm:$0xff]  }
 0x187   :  { %1197 = vmatprep.subr.bf16.mxu0 %v5110_v7  ;;  %v5164_v7 = vld [vmem:[%s6865_s3 + $0x244] ss:$8 sps:$4 sm:$0xff]  }
 0x18e   :  { %1198 = vmatpush1.bf16.xpose.msra.mxu0 %v5108_v56  ;;  %v752_v56 = vmax.f32 %v740_v51, 0.0  ;;  %v5207_v51 = vld [vmem:[%s6865_s3 + $0x330] ss:$8 sps:$4 sm:$0xff]  }
 0x18f   :  { %1199 = vmatprep.subr.bf16.mxu0 %v5113_v12  ;;  %v5162_v12 = vld [vmem:[%s6865_s3 + $0x240] ss:$8 sps:$4 sm:$0xff]  }
 0x196   :  { %1200 = vmatpush1.bf16.xpose.msra.mxu0 %v5111_v54  ;;  %v6077_v54 = vpack.c.bf16 %v752_v56, %v752_v56  ;;  %v5221_v56 = vld [vmem:[%s6865_s3 + $0x374] ss:$8 sps:$4 sm:$0xff]  }
 0x197   :  { %1287 = vmatprep.subr.bf16.mxu0 %v5116_v60  ;;  %v5167_v60 = vld [vmem:[%s6865_s3 + $0x254] ss:$8 sps:$4 sm:$0xff]  }
 0x198   :  { %v1905_v5 = vrot.slane %v6077_v54, 2 }
 0x19d   :  { %1226 = vmatmul.mubr.bf16.vlgmr.msra.gmra.mrb[32].mxu0 %v1149_v18  ;;  %v5168_v18 = vld [vmem:[%s6865_s3 + $0x260] ss:$8 sps:$4 sm:$0xff]  }
 0x19e   :  { %1288 = vmatpush1.bf16.xpose.msra.mxu0 %v5114_v58  ;;  %1319 = vmatprep.mubr.bf16.mxu0 %v1244_v19  ;;  %v6083_v58 = vshrl.u32 %v6051_v52, 16  ;;  %v5171_v19 = vld [vmem:[%s6865_s3 + $0x270] ss:$8 sps:$4 sm:$0xff]  }
 0x19f   :  { %1289 = vmatprep.subr.bf16.mxu0 %v5119_v63  ;;  %v5173_v63 = vld [vmem:[%s6865_s3 + $0x274] ss:$8 sps:$4 sm:$0xff]  }
 0x1a0   :  { %v2000_v46 = vrot.slane %v6083_v58, 2 }
 0x1a6   :  { %1290 = vmatpush1.bf16.xpose.msra.mxu0 %v5117_v1  ;;  %v5176_v1 = vld [vmem:[%s6865_s3 + $0x284] ss:$8 sps:$4 sm:$0xff]  }
 0x1a7   :  { %1291 = vmatprep.subr.bf16.mxu0 %v5122_v20  ;;  %v5174_v20 = vld [vmem:[%s6865_s3 + $0x280] ss:$8 sps:$4 sm:$0xff]  }
 0x1ae   :  { %1292 = vmatpush1.bf16.xpose.msra.mxu0 %v5120_v21  ;;  %v6109_v21 = vshrl.u32 %v6077_v54, 16 }
 0x1af   :  { %1293 = vmatprep.subr.bf16.mxu0 %v5125_v25  ;;  %v5179_v25 = vld [vmem:[%s6865_s3 + $0x294] ss:$8 sps:$4 sm:$0xff]  }
 0x1b6   :  { %1294 = vmatpush1.bf16.xpose.msra.mxu0 %v5123_v42  ;;  %v1718_v42 = vrot.slane %v6051_v52, 1 }
 0x1b7   :  { %1381 = vmatprep.subr.bf16.mxu0 %v5128_v43  ;;  %v5177_v43 = vld [vmem:[%s6865_s3 + $0x290] ss:$8 sps:$4 sm:$0xff]  }
 0x1bd   :  { %1320 = vmatmul.mubr.bf16.vlgmr.msra.gmra.mrb[32].mxu0 %v1243_v3  ;;  %v5180_v3 = vld [vmem:[%s6865_s3 + $0x2a0] ss:$8 sps:$4 sm:$0xff]  }
 0x1be   :  { %1382 = vmatpush1.bf16.xpose.msra.mxu0 %v5126_v2  ;;  %1413 = vmatprep.mubr.bf16.mxu0 %v1338_v6  ;;  %v5182_v2 = vld [vmem:[%s6865_s3 + $0x2a4] ss:$8 sps:$4 sm:$0xff]   ;;  %v5183_v6 = vld [vmem:[%s6865_s3 + $0x2b0] ss:$8 sps:$4 sm:$0xff]  }
 0x1bf   :  { %1383 = vmatprep.subr.bf16.mxu0 %v5131_v4  ;;  %v5185_v4 = vld [vmem:[%s6865_s3 + $0x2b4] ss:$8 sps:$4 sm:$0xff]  }
 0x1c6   :  { %1384 = vmatpush1.bf16.xpose.msra.mxu0 %v5129_v16  ;;  %v5188_v16 = vld [vmem:[%s6865_s3 + $0x2c4] ss:$8 sps:$4 sm:$0xff]  }
 0x1c7   :  { %1385 = vmatprep.subr.bf16.mxu0 %v5134_v28  ;;  %v5186_v28 = vld [vmem:[%s6865_s3 + $0x2c0] ss:$8 sps:$4 sm:$0xff]  }
 0x1ce   :  { %1386 = vmatpush1.bf16.xpose.msra.mxu0 %v5132_v29  ;;  %v1717_v29 = vrot.slane %v6077_v54, 1 }
 0x1cf   :  { %1387 = vmatprep.subr.bf16.mxu0 %v5137_v17  ;;  %v5191_v17 = vld [vmem:[%s6865_s3 + $0x2d4] ss:$8 sps:$4 sm:$0xff]  }
 0x1d6   :  { %1388 = vmatpush1.bf16.xpose.msra.mxu0 %v5135_v31  ;;  %v1812_v31 = vrot.slane %v6083_v58, 1 }
 0x1d7   :  { %1475 = vmatprep.subr.bf16.mxu0 %v5140_v32  ;;  %v5189_v32 = vld [vmem:[%s6865_s3 + $0x2d0] ss:$8 sps:$4 sm:$0xff]  }
 0x1dd   :  { %1414 = vmatmul.mubr.bf16.vlgmr.msra.gmra.mrb[32].mxu0 %v1337_v34  ;;  %v5192_v34 = vld [vmem:[%s6865_s3 + $0x2e0] ss:$8 sps:$4 sm:$0xff]  }
 0x1de   :  { %1476 = vmatpush1.bf16.xpose.msra.mxu0 %v5138_v33  ;;  %1507 = vmatprep.mubr.bf16.mxu0 %v1432_v36  ;;  %v5194_v33 = vld [vmem:[%s6865_s3 + $0x2e4] ss:$8 sps:$4 sm:$0xff]   ;;  %v5195_v36 = vld [vmem:[%s6865_s3 + $0x2f0] ss:$8 sps:$4 sm:$0xff]  }
 0x1df   :  { %1477 = vmatprep.subr.bf16.mxu0 %v5143_v35  ;;  %v5197_v35 = vld [vmem:[%s6865_s3 + $0x2f4] ss:$8 sps:$4 sm:$0xff]  }
 0x1e6   :  { %1478 = vmatpush1.bf16.xpose.msra.mxu0 %v5141_v37  ;;  %v5200_v37 = vld [vmem:[%s6865_s3 + $0x304] ss:$8 sps:$4 sm:$0xff]  }
 0x1e7   :  { %1479 = vmatprep.subr.bf16.mxu0 %v5146_v38  ;;  %v5198_v38 = vld [vmem:[%s6865_s3 + $0x300] ss:$8 sps:$4 sm:$0xff]  }
 0x1ee   :  { %1480 = vmatpush1.bf16.xpose.msra.mxu0 %v5144_v62  ;;  %v1811_v62 = vrot.slane %v6109_v21, 1 }
 0x1ef   :  { %1481 = vmatprep.subr.bf16.mxu0 %v5149_v22  ;;  %v5203_v22 = vld [vmem:[%s6865_s3 + $0x314] ss:$8 sps:$4 sm:$0xff]  }
 0x1f6   :  { %1482 = vmatpush1.bf16.xpose.msra.mxu0 %v5147_v39  ;;  %v1906_v39 = vrot.slane %v6051_v52, 2 }
 0x1f7   :  { %1567 = vmatprep.subr.bf16.mxu0 %v5152_v40  ;;  %v5201_v40 = vld [vmem:[%s6865_s3 + $0x310] ss:$8 sps:$4 sm:$0xff]  }
 0x1fd   :  { %1508 = vmatmul.mubr.bf16.vlgmr.msra.gmra.mrb[32].mxu0 %v1431_v49  ;;  %v675_v49 = vpop.f32.mrb[28].mxu1 }
 0x1fe   :  { %1568 = vmatpush1.bf16.xpose.msra.mxu0 %v5150_v47  ;;  %1599 = vmatprep.mubr.bf16.mxu0 %v6051_v52  ;;  %v5209_v47 = vld [vmem:[%s6865_s3 + $0x334] ss:$8 sps:$4 sm:$0xff]  }
 0x1ff   :  { %1569 = vmatprep.subr.bf16.mxu0 %v5155_v50  ;;  %v704_v50 = vmax.f32 %v5815_v26, %v675_v49  ;;  %v5212_v26 = vld [vmem:[%s6865_s3 + $0x344] ss:$8 sps:$4 sm:$0xff]   ;;  %v5258_v49 = vld [vmem:[%s6865_s3 + $0x440] ss:$8 sps:$4 sm:$0xff]  }
 0x206   :  { %1570 = vmatpush1.bf16.xpose.msra.mxu0 %v5153_v10  ;;  %v677_v10 = vpop.f32.mrb[29].mxu1 }
 0x207   :  { %1571 = vmatprep.subr.bf16.mxu0 %v5158_v53  ;;  %v705_v53 = vmax.f32 %v5817_v27, %v677_v10  ;;  %v5216_v27 = vld [vmem:[%s6865_s3 + $0x360] ss:$8 sps:$4 sm:$0xff]   ;;  %v5263_v10 = vld [vmem:[%s6865_s3 + $0x454] ss:$8 sps:$4 sm:$0xff]  }
 0x20e   :  { %1572 = vmatpush1.bf16.xpose.msra.mxu0 %v5156_v13  ;;  %v679_v13 = vpop.f32.mrb[30].mxu1 }
 0x20f   :  { %1573 = vmatprep.subr.bf16.mxu0 %v5161_v57  ;;  %v6185_v57 = vmax.f32 %v692_v8, %v704_v50  ;;  %v5215_v8 = vld [vmem:[%s6865_s3 + $0x354] ss:$8 sps:$4 sm:$0xff]   ;;  %v5266_v13 = vld [vmem:[%s6865_s3 + $0x464] ss:$8 sps:$4 sm:$0xff]  }
 0x216   :  { %1574 = vmatpush1.bf16.xpose.msra.mxu0 %v5159_v61  ;;  %v680_v61 = vpop.f32.mrb[31].mxu1 }
 0x217   :  { %1665 = vmatprep.subr.bf16.mxu0 %v5164_v7  ;;  %v6193_v7 = vmax.f32 %v693_v11, %v705_v53  ;;  %v5218_v11 = vld [vmem:[%s6865_s3 + $0x364] ss:$8 sps:$4 sm:$0xff]   ;;  %v5264_v61 = vld [vmem:[%s6865_s3 + $0x460] ss:$8 sps:$4 sm:$0xff]  }
 0x21d   :  { %1600 = vmatmul.mubr.bf16.vlgmr.msra.gmra.mrb[32].mxu0 %v6077_v54 }
 0x21e   :  { %1666 = vmatpush1.bf16.xpose.msra.mxu0 %v5162_v12  ;;  %1697 = vmatprep.mubr.bf16.mxu0 %v6083_v58  ;;  %v5219_v12 = vld [vmem:[%s6865_s3 + $0x370] ss:$8 sps:$4 sm:$0xff]  }
 0x21f   :  { %1667 = vmatprep.subr.bf16.mxu0 %v5167_v60  ;;  %v5224_v60 = vld [vmem:[%s6865_s3 + $0x384] ss:$8 sps:$4 sm:$0xff]  }
 0x226   :  { %1668 = vmatpush1.bf16.xpose.msra.mxu0 %v5165_v59  ;;  %v5222_v59 = vld [vmem:[%s6865_s3 + $0x380] ss:$8 sps:$4 sm:$0xff]  }
 0x227   :  { %1669 = vmatprep.subr.bf16.mxu0 %v5170_v0  ;;  %v1999_v0 = vrot.slane %v6109_v21, 2 }
 0x22e   :  { %1670 = vmatpush1.bf16.xpose.msra.mxu0 %v5168_v18  ;;  %v5227_v18 = vld [vmem:[%s6865_s3 + $0x394] ss:$8 sps:$4 sm:$0xff]  }
 0x22f   :  { %1671 = vmatprep.subr.bf16.mxu0 %v5173_v63  ;;  %v2094_v63 = vrot.slane %v6051_v52, 3  ;;  %v5230_v52 = vld [vmem:[%s6865_s3 + $0x3a4] ss:$8 sps:$4 sm:$0xff]  }
 0x236   :  { %1672 = vmatpush1.bf16.xpose.msra.mxu0 %v5171_v19  ;;  %v5270_v19 = vld [vmem:[%s6867_s5] sm:$0x1f]  }
 0x237   :  { %1761 = vmatprep.subr.bf16.mxu0 %v5176_v1  ;;  %v5514_v1 = vmov 0.0  }
 0x238   :  { %4895 = vmatprep.subr.bf16.mxu1 %v5514_v1  ;;  %4897 = vmatprep.mubr.msk.bf16.mxu1 %vm5515_vm4, %v5514_v1 }
 0x23d   :  { %1698 = vmatmul.mubr.bf16.vlgmr.msra.gmra.mrb[32].mxu0 %v6109_v21 }
 0x23e   :  { %1762 = vmatpush1.bf16.xpose.msra.mxu0 %v5174_v20  ;;  %1793 = vmatprep.mubr.bf16.mxu0 %v1718_v42  ;;  %v2477_v20 = vsel %vm2472_vm3, %v5270_v19, 0  ;;  %v5228_v42 = vld [vmem:[%s6865_s3 + $0x3a0] ss:$8 sps:$4 sm:$0xff]   ;;  %v5274_v19 = vld [vmem:[%s6865_s3 + $0x10] ss:$8 sps:$4 sm:$0xff]  }
 0x23f   :  { %1763 = vmatprep.subr.bf16.mxu0 %v5179_v25  ;;  %4896 = vmatpush3.bf16.xpose.msra.mxu1 %v2477_v20  ;;  %v5225_v25 = vld [vmem:[%s6865_s3 + $0x390] ss:$8 sps:$4 sm:$0xff]   ;;  %v5277_v20 = vld [vmem:[%s6865_s3 + $0x20] ss:$8 sps:$4 sm:$0xff]  }
 0x246   :  { %1764 = vmatpush1.bf16.xpose.msra.mxu0 %v5177_v43  ;;  %v5233_v43 = vld [vmem:[%s6865_s3 + $0x3b4] ss:$8 sps:$4 sm:$0xff]  }
 0x247   :  { %1765 = vmatprep.subr.bf16.mxu0 %v5182_v2  ;;  %v5231_v2 = vld [vmem:[%s6865_s3 + $0x3b0] ss:$8 sps:$4 sm:$0xff]  }
 0x24e   :  { %1766 = vmatpush1.bf16.xpose.msra.mxu0 %v5180_v3  ;;  %v5236_v3 = vld [vmem:[%s6865_s3 + $0x3c4] ss:$8 sps:$4 sm:$0xff]  }
 0x24f   :  { %1767 = vmatprep.subr.bf16.mxu0 %v5185_v4  ;;  %v5234_v4 = vld [vmem:[%s6865_s3 + $0x3c0] ss:$8 sps:$4 sm:$0xff]  }
 0x256   :  { %1768 = vmatpush1.bf16.xpose.msra.mxu0 %v5183_v6  ;;  %v2093_v6 = vrot.slane %v6077_v54, 3  ;;  %v5240_v54 = vld [vmem:[%s6865_s3 + $0x3e0] ss:$8 sps:$4 sm:$0xff]  }
 0x257   :  { %1855 = vmatprep.subr.bf16.mxu0 %v5188_v16  ;;  %v5239_v16 = vld [vmem:[%s6865_s3 + $0x3d4] ss:$8 sps:$4 sm:$0xff]  }
 0x25d   :  { %1794 = vmatmul.mubr.bf16.vlgmr.msra.gmra.mrb[32].mxu0 %v1717_v29  ;;  %v5237_v29 = vld [vmem:[%s6865_s3 + $0x3d0] ss:$8 sps:$4 sm:$0xff]  }
 0x25e   :  { %1856 = vmatpush1.bf16.xpose.msra.mxu0 %v5186_v28  ;;  %1887 = vmatprep.mubr.bf16.mxu0 %v1812_v31  ;;  %v2188_v28 = vrot.slane %v6083_v58, 3  ;;  %v5245_v58 = vld [vmem:[%s6865_s3 + $0x3f4] ss:$8 sps:$4 sm:$0xff]   ;;  %v6275_v31 = vpop.permute.xlu1 %733 }
 0x25f   :  { %1857 = vmatprep.subr.bf16.mxu0 %v5191_v17  ;;  %v5242_v17 = vld [vmem:[%s6865_s3 + $0x3e4] ss:$8 sps:$4 sm:$0xff]  }
 0x266   :  { %1858 = vmatpush1.bf16.xpose.msra.mxu0 %v5189_v32  ;;  %v5243_v32 = vld [vmem:[%s6865_s3 + $0x3f0] ss:$8 sps:$4 sm:$0xff]  }
 0x267   :  { %1859 = vmatprep.subr.bf16.mxu0 %v5194_v33  ;;  %v5248_v33 = vld [vmem:[%s6865_s3 + $0x404] ss:$8 sps:$4 sm:$0xff]  }
 0x26e   :  { %1860 = vmatpush1.bf16.xpose.msra.mxu0 %v5192_v34  ;;  %v745_v34 = vadd.f32 %v6275_v31, %v5862_v24  ;;  %v5249_v24 = vld [vmem:[%s6865_s3 + $0x410] ss:$8 sps:$4 sm:$0xff]  }
 0x26f   :  { %1861 = vmatprep.subr.bf16.mxu0 %v5197_v35 }
 0x270   :  { %v757_v35 = vmax.f32 %v745_v34, 0.0 }
 0x276   :  { %1862 = vmatpush1.bf16.xpose.msra.mxu0 %v5195_v36  ;;  %v5246_v36 = vld [vmem:[%s6865_s3 + $0x400] ss:$8 sps:$4 sm:$0xff]  }
 0x277   :  { %1949 = vmatprep.subr.bf16.mxu0 %v5200_v37  ;;  %v2187_v37 = vrot.slane %v6109_v21, 3  ;;  %v5252_v21 = vld [vmem:[%s6865_s3 + $0x420] ss:$8 sps:$4 sm:$0xff]  }
 0x27d   :  { %1888 = vmatmul.mubr.bf16.vlgmr.msra.gmra.mrb[32].mxu0 %v1811_v62  ;;  %v2273_v62 = vpack.c.bf16 %v757_v35, %v757_v35  ;;  %v5298_v35 = vld [vmem:[%s6865_s3 + $0x90] ss:$8 sps:$4 sm:$0xff]  }
 0x27e   :  { %1950 = vmatpush1.bf16.xpose.msra.mxu0 %v5198_v38  ;;  %1981 = vmatprep.mubr.bf16.mxu0 %v1906_v39  ;;  %v5251_v38 = vld [vmem:[%s6865_s3 + $0x414] ss:$8 sps:$4 sm:$0xff]  }
 0x27f   :  { %1951 = vmatprep.subr.bf16.mxu0 %v5203_v22  ;;  %v5254_v22 = vld [vmem:[%s6865_s3 + $0x424] ss:$8 sps:$4 sm:$0xff]   ;;  %v5257_v39 = vld [vmem:[%s6865_s3 + $0x434] ss:$8 sps:$4 sm:$0xff]   ;;  %v2377_v53 = vshrl.u32 %v2273_v62, 16 }
 0x286   :  { %1952 = vmatpush1.bf16.xpose.msra.mxu0 %v5201_v40  ;;  %v5255_v40 = vld [vmem:[%s6865_s3 + $0x430] ss:$8 sps:$4 sm:$0xff]  }
 0x287   :  { %1953 = vmatprep.subr.bf16.mxu0 %v5206_v41  ;;  %v744_v41 = vadd.f32 %v6275_v31, %v5856_v23  ;;  %v5261_v23 = vld [vmem:[%s6865_s3 + $0x450] ss:$8 sps:$4 sm:$0xff]  }
 0x28e   :  { %1954 = vmatpush1.bf16.xpose.msra.mxu0 %v5204_v45  ;;  %v5260_v45 = vld [vmem:[%s6865_s3 + $0x444] ss:$8 sps:$4 sm:$0xff]  }
 0x28f   :  { %1955 = vmatprep.subr.bf16.mxu0 %v5209_v47  ;;  %v756_v47 = vmax.f32 %v744_v41, 0.0  ;;  %v5310_v41 = vld [vmem:[%s6865_s3 + $0xd0] ss:$8 sps:$4 sm:$0xff]  }
 0x291   :  { %v2272_v50 = vpack.c.bf16 %v756_v47, %v756_v47  ;;  %v5313_v47 = vld [vmem:[%s6865_s3 + $0xe0] ss:$8 sps:$4 sm:$0xff]  }
 0x296   :  { %1956 = vmatpush1.bf16.xpose.msra.mxu0 %v5207_v51  ;;  %v5269_v51 = vld [vmem:[%s6865_s3 + $0x474] ss:$8 sps:$4 sm:$0xff]  }
 0x297   :  { %2043 = vmatprep.subr.bf16.mxu0 %v5212_v26  ;;  %v5267_v26 = vld [vmem:[%s6865_s3 + $0x470] ss:$8 sps:$4 sm:$0xff]  }
 0x29d   :  { %1982 = vmatmul.mubr.bf16.vlgmr.msra.gmra.mrb[32].mxu0 %v1905_v5  ;;  %v5273_v5 = vld [vmem:[%s6865_s3 + $0x4] ss:$8 sps:$4 sm:$0xff]  }
 0x29e   :  { %2044 = vmatpush1.bf16.xpose.msra.mxu0 %v5210_v44  ;;  %2075 = vmatprep.mubr.bf16.mxu0 %v2000_v46  ;;  %v2374_v44 = vshrl.u32 %v2272_v50, 16  ;;  %v760_v46 = vld [vmem:[%s6866_s4] sm:$0x1] }
 0x29f   :  { %2045 = vmatprep.subr.bf16.mxu0 %v5215_v8  ;;  %2572 = vmatprep.subr.bf16.mxu1 %v5273_v5  ;;  %v739_v8 = vadd.f32 %v5819_v30, %v5823_v55  ;;  %v5276_v55 = vld [vmem:[%s6865_s3 + $0x14] ss:$8 sps:$4 sm:$0xff]  }
 0x2a0   :  { %v5330_v5 = vld [vmem:[%s6865_s3 + $0x134] ss:$8 sps:$4 sm:$0xff]  }
 0x2a6   :  { %2046 = vmatpush1.bf16.xpose.msra.mxu0 %v5213_v9 }
 0x2a7   :  { %2047 = vmatprep.subr.bf16.mxu0 %v5218_v11 }
 0x2ae   :  { %2048 = vmatpush1.bf16.xpose.msra.mxu0 %v5216_v27 }
 0x2af   :  { %2049 = vmatprep.subr.bf16.mxu0 %v5221_v56  ;;  %v751_v56 = vmax.f32 %v739_v8, 0.0  ;;  %v5328_v8 = vld [vmem:[%s6865_s3 + $0x130] ss:$8 sps:$4 sm:$0xff]  }
 0x2b6   :  { %2050 = vmatpush1.bf16.xpose.msra.mxu0 %v5219_v12 }
 0x2b7   :  { %2137 = vmatprep.subr.bf16.mxu0 %v5224_v60 }
 0x2bd   :  { %2076 = vmatmul.mubr.bf16.vlgmr.msra.gmra.mrb[32].mxu0 %v1999_v0  ;;  %v5271_v0 = vld [vmem:[%s6865_s3] ss:$8 sps:$4 sm:$0xff]  }
 0x2be   :  { %2138 = vmatpush1.bf16.xpose.msra.mxu0 %v5222_v59  ;;  %2169 = vmatprep.mubr.bf16.mxu0 %v2094_v63  ;;  %v6350_v63 = vpack.c.bf16 %v751_v56, %v751_v56 }
 0x2bf   :  { %2139 = vmatprep.subr.bf16.mxu0 %v5227_v18 }
 0x2c0   :  { %v2721_v34 = vrot.slane %v6350_v63, 1 }
 0x2c6   :  { %2140 = vmatpush1.bf16.xpose.msra.mxu0 %v5225_v25  ;;  %v5282_v25 = vld [vmem:[%s6865_s3 + $0x34] ss:$8 sps:$4 sm:$0xff]  }
 0x2c7   :  { %2141 = vmatprep.subr.bf16.mxu0 %v5230_v52  ;;  %v5280_v52 = vld [vmem:[%s6865_s3 + $0x30] ss:$8 sps:$4 sm:$0xff]  }
 0x2ce   :  { %2142 = vmatpush1.bf16.xpose.msra.mxu0 %v5228_v42  ;;  %v738_v42 = vadd.f32 %v5819_v30, %v5821_v48  ;;  %v5286_v30 = vld [vmem:[%s6865_s3 + $0x50] ss:$8 sps:$4 sm:$0xff]   ;;  %v5291_v48 = vld [vmem:[%s6865_s3 + $0x64] ss:$8 sps:$4 sm:$0xff]  }
 0x2cf   :  { %2143 = vmatprep.subr.bf16.mxu0 %v5233_v43  ;;  %v5285_v43 = vld [vmem:[%s6865_s3 + $0x44] ss:$8 sps:$4 sm:$0xff]  }
 0x2d6   :  { %2144 = vmatpush1.bf16.xpose.msra.mxu0 %v5231_v2  ;;  %v750_v2 = vmax.f32 %v738_v42, 0.0  ;;  %v5351_v42 = vld [vmem:[%s6865_s3 + $0x1a4] ss:$8 sps:$4 sm:$0xff]  }
 0x2d7   :  { %2231 = vmatprep.subr.bf16.mxu0 %v5236_v3  ;;  %v5283_v3 = vld [vmem:[%s6865_s3 + $0x40] ss:$8 sps:$4 sm:$0xff]  }
 0x2dd   :  { %2170 = vmatmul.mubr.bf16.vlgmr.msra.gmra.mrb[32].mxu0 %v2093_v6  ;;  %v5288_v6 = vld [vmem:[%s6865_s3 + $0x54] ss:$8 sps:$4 sm:$0xff]  }
 0x2de   :  { %2232 = vmatpush1.bf16.xpose.msra.mxu0 %v5234_v4  ;;  %2263 = vmatprep.mubr.bf16.mxu0 %v2188_v28  ;;  %v6377_v4 = vpack.c.bf16 %v750_v2, %v750_v2  ;;  %v5289_v28 = vld [vmem:[%s6865_s3 + $0x60] ss:$8 sps:$4 sm:$0xff]  }
 0x2df   :  { %2233 = vmatprep.subr.bf16.mxu0 %v5239_v16  ;;  %v6383_v16 = vshrl.u32 %v6350_v63, 16  ;;  %v2466_v2 = vld [vmem:[%s6868_s6] sm:$0x1] }
 0x2e1   :  { %v3000_v56 = vrot.slane %v6383_v16, 2 }
 0x2e6   :  { %2234 = vmatpush1.bf16.xpose.msra.mxu0 %v5237_v29  ;;  %v5294_v29 = vld [vmem:[%s6865_s3 + $0x74] ss:$8 sps:$4 sm:$0xff]  }
 0x2e7   :  { %2235 = vmatprep.subr.bf16.mxu0 %v5242_v17  ;;  %v5292_v17 = vld [vmem:[%s6865_s3 + $0x70] ss:$8 sps:$4 sm:$0xff]  }
 0x2ee   :  { %2236 = vmatpush1.bf16.xpose.msra.mxu0 %v5240_v54  ;;  %v5297_v54 = vld [vmem:[%s6865_s3 + $0x84] ss:$8 sps:$4 sm:$0xff]  }
 0x2ef   :  { %2237 = vmatprep.subr.bf16.mxu0 %v5245_v58  ;;  %v5295_v58 = vld [vmem:[%s6865_s3 + $0x80] ss:$8 sps:$4 sm:$0xff]  }
 0x2f6   :  { %2238 = vmatpush1.bf16.xpose.msra.mxu0 %v5243_v32  ;;  %v6409_v32 = vshrl.u32 %v6377_v4, 16 }
 0x2f7   :  { %2323 = vmatprep.subr.bf16.mxu0 %v5248_v33  ;;  %v5300_v33 = vld [vmem:[%s6865_s3 + $0x94] ss:$8 sps:$4 sm:$0xff]  }
 0x2fd   :  { %2264 = vmatmul.mubr.bf16.vlgmr.msra.gmra.mrb[32].mxu0 %v2187_v37  ;;  %v5301_v37 = vld [vmem:[%s6865_s3 + $0xa0] ss:$8 sps:$4 sm:$0xff]  }
 0x2fe   :  { %2324 = vmatpush1.bf16.xpose.msra.mxu0 %v5246_v36  ;;  %2355 = vmatprep.mubr.bf16.mxu0 %v2273_v62  ;;  %v5303_v36 = vld [vmem:[%s6865_s3 + $0xa4] ss:$8 sps:$4 sm:$0xff]   ;;  %v5304_v62 = vld [vmem:[%s6865_s3 + $0xb0] ss:$8 sps:$4 sm:$0xff]  }
 0x2ff   :  { %2325 = vmatprep.subr.bf16.mxu0 %v5251_v38  ;;  %v5306_v38 = vld [vmem:[%s6865_s3 + $0xb4] ss:$8 sps:$4 sm:$0xff]  }
 0x306   :  { %2326 = vmatpush1.bf16.xpose.msra.mxu0 %v5249_v24  ;;  %v5309_v24 = vld [vmem:[%s6865_s3 + $0xc4] ss:$8 sps:$4 sm:$0xff]  }
 0x307   :  { %2327 = vmatprep.subr.bf16.mxu0 %v5254_v22  ;;  %v5307_v22 = vld [vmem:[%s6865_s3 + $0xc0] ss:$8 sps:$4 sm:$0xff]  }
 0x30e   :  { %2328 = vmatpush1.bf16.xpose.msra.mxu0 %v5252_v21  ;;  %v2720_v21 = vrot.slane %v6377_v4, 1 }
 0x30f   :  { %2329 = vmatprep.subr.bf16.mxu0 %v5257_v39  ;;  %v5312_v39 = vld [vmem:[%s6865_s3 + $0xd4] ss:$8 sps:$4 sm:$0xff]  }
 0x316   :  { %2330 = vmatpush1.bf16.xpose.msra.mxu0 %v5255_v40  ;;  %v2814_v40 = vrot.slane %v6383_v16, 1 }
 0x317   :  { %2421 = vmatprep.subr.bf16.mxu0 %v5260_v45  ;;  %v5315_v45 = vld [vmem:[%s6865_s3 + $0xe4] ss:$8 sps:$4 sm:$0xff]  }
 0x31d   :  { %2356 = vmatmul.mubr.bf16.vlgmr.msra.gmra.mrb[32].mxu0 %v2272_v50  ;;  %v5316_v50 = vld [vmem:[%s6865_s3 + $0xf0] ss:$8 sps:$4 sm:$0xff]  }
 0x31e   :  { %2422 = vmatpush1.bf16.xpose.msra.mxu0 %v5258_v49  ;;  %2453 = vmatprep.mubr.bf16.mxu0 %v2377_v53  ;;  %v5318_v49 = vld [vmem:[%s6865_s3 + $0xf4] ss:$8 sps:$4 sm:$0xff]   ;;  %v5319_v53 = vld [vmem:[%s6865_s3 + $0x100] ss:$8 sps:$4 sm:$0xff]  }
 0x31f   :  { %2423 = vmatprep.subr.bf16.mxu0 %v5263_v10  ;;  %v5321_v10 = vld [vmem:[%s6865_s3 + $0x104] ss:$8 sps:$4 sm:$0xff]  }
 0x326   :  { %2424 = vmatpush1.bf16.xpose.msra.mxu0 %v5261_v23  ;;  %v2813_v23 = vrot.slane %v6409_v32, 1 }
 0x327   :  { %2425 = vmatprep.subr.bf16.mxu0 %v5266_v13  ;;  %v5324_v13 = vld [vmem:[%s6865_s3 + $0x114] ss:$8 sps:$4 sm:$0xff]  }
 0x32e   :  { %2426 = vmatpush1.bf16.xpose.msra.mxu0 %v5264_v61  ;;  %v2907_v61 = vrot.slane %v6350_v63, 2 }
 0x32f   :  { %2427 = vmatprep.subr.bf16.mxu0 %v5269_v51  ;;  %v5322_v51 = vld [vmem:[%s6865_s3 + $0x110] ss:$8 sps:$4 sm:$0xff]  }
 0x336   :  { %2428 = vmatpush1.bf16.xpose.msra.mxu0 %v5267_v26  ;;  %v5327_v26 = vld [vmem:[%s6865_s3 + $0x124] ss:$8 sps:$4 sm:$0xff]  }
 0x337   :  { %4901 = vmatprep.subr.bf16.mxu0 %v5514_v1 }
 0x33d   :  { %2454 = vmatmul.mubr.bf16.vlgmr.msra.gmra.mrb[32].mxu0 %v2374_v44  ;;  %v5325_v44 = vld [vmem:[%s6865_s3 + $0x120] ss:$8 sps:$4 sm:$0xff]  }
 0x33e   :  { %4903 = vmatprep.mubr.msk.bf16.mxu0 %vm5515_vm4, %v5514_v1  ;;  %v5279_v1 = vld [vmem:[%s6865_s3 + $0x24] ss:$8 sps:$4 sm:$0xff]  }
 0x410   :  { %v2455_v9 = vpop.f32.mrb[32].mxu0 }
 0x411   :  { %v4907_v11 = vadd.f32 %v2455_v9, %v760_v46  ;;  %v2457_v27 = vpop.f32.mrb[33].mxu0  ;;  %v5333_v46 = vld [vmem:[%s6865_s3 + $0x144] ss:$8 sps:$4 sm:$0xff]   ;;  %v5331_v9 = vld [vmem:[%s6865_s3 + $0x140] ss:$8 sps:$4 sm:$0xff]  }
 0x412   :  { %v2458_v12 = vpop.f32.mrb[34].mxu0  ;;  %v5336_v27 = vld [vmem:[%s6865_s3 + $0x154] ss:$8 sps:$4 sm:$0xff]  }
 0x413   :  { %v2462_v60 = vmax.f32 %v4907_v11, 0.0  ;;  %v2459_v59 = vpop.f32.mrb[35].mxu0  ;;  %v2906_v11 = vrot.slane %v6377_v4, 2  ;;  %v5334_v12 = vld [vmem:[%s6865_s3 + $0x150] ss:$8 sps:$4 sm:$0xff]  }
 0x414   :  { %v5337_v59 = vld [vmem:[%s6865_s3 + $0x160] ss:$8 sps:$4 sm:$0xff]  }
 0x415   :  { %v2463_v18 = vpack.c.bf16 %v2462_v60, %v2462_v60  ;;  %v5339_v60 = vld [vmem:[%s6865_s3 + $0x164] ss:$8 sps:$4 sm:$0xff]  }
 0x417   :  { %4898 = vmatmul.mubr.msk.bf16.vlgmr.msra.gmra.mrb[32].mxu1 %vm2472_vm3, %v2463_v18  ;;  %v5340_v18 = vld [vmem:[%s6865_s3 + $0x170] ss:$8 sps:$4 sm:$0xff]  }
 0x418   :  { %2573 = vmatpush1.bf16.xpose.msra.mxu1 %v5271_v0  ;;  %2604 = vmatprep.mubr.bf16.mxu1 %v6350_v63  ;;  %v5342_v0 = vld [vmem:[%s6865_s3 + $0x174] ss:$8 sps:$4 sm:$0xff]  }
 0x419   :  { %2574 = vmatprep.subr.bf16.mxu1 %v5276_v55  ;;  %v5345_v55 = vld [vmem:[%s6865_s3 + $0x184] ss:$8 sps:$4 sm:$0xff]  }
 0x420   :  { %2575 = vmatpush1.bf16.xpose.msra.mxu1 %v5274_v19  ;;  %v5343_v19 = vld [vmem:[%s6865_s3 + $0x180] ss:$8 sps:$4 sm:$0xff]  }
 0x421   :  { %2576 = vmatprep.subr.bf16.mxu1 %v5279_v1  ;;  %v2999_v1 = vrot.slane %v6409_v32, 2 }
 0x428   :  { %2577 = vmatpush1.bf16.xpose.msra.mxu1 %v5277_v20  ;;  %v5348_v20 = vld [vmem:[%s6865_s3 + $0x194] ss:$8 sps:$4 sm:$0xff]  }
 0x429   :  { %2578 = vmatprep.subr.bf16.mxu1 %v5282_v25  ;;  %v3093_v25 = vrot.slane %v6350_v63, 3  ;;  %v5354_v63 = vld [vmem:[%s6865_s3 + $0x1b4] ss:$8 sps:$4 sm:$0xff]  }
 0x430   :  { %2579 = vmatpush1.bf16.xpose.msra.mxu1 %v5280_v52  ;;  %v5346_v52 = vld [vmem:[%s6865_s3 + $0x190] ss:$8 sps:$4 sm:$0xff]  }
 0x431   :  { %2669 = vmatprep.subr.bf16.mxu1 %v5285_v43  ;;  %v5349_v43 = vld [vmem:[%s6865_s3 + $0x1a0] ss:$8 sps:$4 sm:$0xff]  }
 0x437   :  { %2605 = vmatmul.mubr.bf16.vlgmr.msra.gmra.mrb[36].mxu1 %v6377_v4 }
 0x438   :  { %2670 = vmatpush1.bf16.xpose.msra.mxu1 %v5283_v3  ;;  %2701 = vmatprep.mubr.bf16.mxu1 %v6383_v16 }
 0x439   :  { %2671 = vmatprep.subr.bf16.mxu1 %v5288_v6 }
 0x440   :  { %2672 = vmatpush1.bf16.xpose.msra.mxu1 %v5286_v30 }
 0x441   :  { %2673 = vmatprep.subr.bf16.mxu1 %v5291_v48 }
 0x448   :  { %2674 = vmatpush1.bf16.xpose.msra.mxu1 %v5289_v28  ;;  %v5352_v28 = vld [vmem:[%s6865_s3 + $0x1b0] ss:$8 sps:$4 sm:$0xff]  }
 0x449   :  { %2675 = vmatprep.subr.bf16.mxu1 %v5294_v29 }
 0x450   :  { %2676 = vmatpush1.bf16.xpose.msra.mxu1 %v5292_v17  ;;  %v5357_v17 = vld [vmem:[%s6865_s3 + $0x1c4] ss:$8 sps:$4 sm:$0xff]  }
 0x451   :  { %2764 = vmatprep.subr.bf16.mxu1 %v5297_v54  ;;  %v5355_v54 = vld [vmem:[%s6865_s3 + $0x1c0] ss:$8 sps:$4 sm:$0xff]  }
 0x457   :  { %2702 = vmatmul.mubr.bf16.vlgmr.msra.gmra.mrb[36].mxu1 %v6409_v32 }
 0x458   :  { %2765 = vmatpush1.bf16.xpose.msra.mxu1 %v5295_v58  ;;  %2796 = vmatprep.mubr.bf16.mxu1 %v2721_v34  ;;  %v3092_v58 = vrot.slane %v6377_v4, 3  ;;  %v3186_v34 = vrot.slane %v6383_v16, 3  ;;  %v5361_v4 = vld [vmem:[%s6865_s3 + $0x1e0] ss:$8 sps:$4 sm:$0xff]   ;;  %v5366_v16 = vld [vmem:[%s6865_s3 + $0x1f4] ss:$8 sps:$4 sm:$0xff]  }
 0x459   :  { %2766 = vmatprep.subr.bf16.mxu1 %v5300_v33  ;;  %v5360_v33 = vld [vmem:[%s6865_s3 + $0x1d4] ss:$8 sps:$4 sm:$0xff]  }
 0x460   :  { %2767 = vmatpush1.bf16.xpose.msra.mxu1 %v5298_v35  ;;  %v5358_v35 = vld [vmem:[%s6865_s3 + $0x1d0] ss:$8 sps:$4 sm:$0xff]  }
 0x461   :  { %2768 = vmatprep.subr.bf16.mxu1 %v5303_v36  ;;  %v5363_v36 = vld [vmem:[%s6865_s3 + $0x1e4] ss:$8 sps:$4 sm:$0xff]  }
 0x468   :  { %2769 = vmatpush1.bf16.xpose.msra.mxu1 %v5301_v37  ;;  %v5364_v37 = vld [vmem:[%s6865_s3 + $0x1f0] ss:$8 sps:$4 sm:$0xff]  }
 0x469   :  { %2770 = vmatprep.subr.bf16.mxu1 %v5306_v38  ;;  %v5369_v38 = vld [vmem:[%s6865_s3 + $0x204] ss:$8 sps:$4 sm:$0xff]  }
 0x470   :  { %2771 = vmatpush1.bf16.xpose.msra.mxu1 %v5304_v62  ;;  %v755_v62 = vmax.f32 %v5837_v15, 0.0  ;;  %v5370_v15 = vld [vmem:[%s6865_s3 + $0x210] ss:$8 sps:$4 sm:$0xff]  }
 0x471   :  { %2857 = vmatprep.subr.bf16.mxu1 %v5309_v24  ;;  %v5367_v24 = vld [vmem:[%s6865_s3 + $0x200] ss:$8 sps:$4 sm:$0xff]  }
 0x477   :  { %2797 = vmatmul.mubr.bf16.vlgmr.msra.gmra.mrb[36].mxu1 %v2720_v21  ;;  %v5372_v21 = vld [vmem:[%s6865_s3 + $0x214] ss:$8 sps:$4 sm:$0xff]  }
 0x478   :  { %2858 = vmatpush1.bf16.xpose.msra.mxu1 %v5307_v22  ;;  %2889 = vmatprep.mubr.bf16.mxu1 %v2814_v40  ;;  %v3185_v22 = vrot.slane %v6409_v32, 3  ;;  %v5375_v40 = vld [vmem:[%s6865_s3 + $0x224] ss:$8 sps:$4 sm:$0xff]   ;;  %v5373_v32 = vld [vmem:[%s6865_s3 + $0x220] ss:$8 sps:$4 sm:$0xff]  }
 0x479   :  { %2859 = vmatprep.subr.bf16.mxu1 %v5312_v39  ;;  %v6576_v39 = vpack.c.bf16 %v755_v62, %v755_v62  ;;  %v5441_v62 = vld [vmem:[%s6865_s3 + $0x384] ss:$8 sps:$4 sm:$0xff]  }
 0x480   :  { %2860 = vmatpush1.bf16.xpose.msra.mxu1 %v5310_v41  ;;  %v5378_v41 = vld [vmem:[%s6865_s3 + $0x234] ss:$8 sps:$4 sm:$0xff]  }
 0x481   :  { %2861 = vmatprep.subr.bf16.mxu1 %v5315_v45  ;;  %v5376_v45 = vld [vmem:[%s6865_s3 + $0x230] ss:$8 sps:$4 sm:$0xff]  }
 0x488   :  { %2862 = vmatpush1.bf16.xpose.msra.mxu1 %v5313_v47  ;;  %v5381_v47 = vld [vmem:[%s6865_s3 + $0x244] ss:$8 sps:$4 sm:$0xff]  }
 0x489   :  { %2863 = vmatprep.subr.bf16.mxu1 %v5318_v49  ;;  %v754_v49 = vmax.f32 %v5834_v14, 0.0  ;;  %v5382_v14 = vld [vmem:[%s6865_s3 + $0x250] ss:$8 sps:$4 sm:$0xff]  }
 0x490   :  { %2864 = vmatpush1.bf16.xpose.msra.mxu1 %v5316_v50  ;;  %v5379_v50 = vld [vmem:[%s6865_s3 + $0x240] ss:$8 sps:$4 sm:$0xff]  }
 0x491   :  { %2950 = vmatprep.subr.bf16.mxu1 %v5321_v10  ;;  %v6601_v10 = vpack.c.bf16 %v754_v49, %v754_v49  ;;  %v5451_v49 = vld [vmem:[%s6865_s3 + $0x3c0] ss:$8 sps:$4 sm:$0xff]  }
 0x497   :  { %2890 = vmatmul.mubr.bf16.vlgmr.msra.gmra.mrb[36].mxu1 %v2813_v23  ;;  %v6607_v23 = vshrl.u32 %v6576_v39, 16 }
 0x498   :  { %2951 = vmatpush1.bf16.xpose.msra.mxu1 %v5319_v53  ;;  %2982 = vmatprep.mubr.bf16.mxu1 %v2907_v61  ;;  %v5384_v53 = vld [vmem:[%s6865_s3 + $0x254] ss:$8 sps:$4 sm:$0xff]   ;;  %v5385_v61 = vld [vmem:[%s6865_s3 + $0x260] ss:$8 sps:$4 sm:$0xff]  }
 0x499   :  { %2952 = vmatprep.subr.bf16.mxu1 %v5324_v13  ;;  %v5387_v13 = vld [vmem:[%s6865_s3 + $0x264] ss:$8 sps:$4 sm:$0xff]  }
 0x4a0   :  { %2953 = vmatpush1.bf16.xpose.msra.mxu1 %v5322_v51  ;;  %v5390_v51 = vld [vmem:[%s6865_s3 + $0x274] ss:$8 sps:$4 sm:$0xff]  }
 0x4a1   :  { %2954 = vmatprep.subr.bf16.mxu1 %v5327_v26  ;;  %v5388_v26 = vld [vmem:[%s6865_s3 + $0x270] ss:$8 sps:$4 sm:$0xff]  }
 0x4a8   :  { %2955 = vmatpush1.bf16.xpose.msra.mxu1 %v5325_v44  ;;  %v5393_v44 = vld [vmem:[%s6865_s3 + $0x284] ss:$8 sps:$4 sm:$0xff]  }
 0x4a9   :  { %2956 = vmatprep.subr.bf16.mxu1 %v5330_v5  ;;  %v5391_v5 = vld [vmem:[%s6865_s3 + $0x280] ss:$8 sps:$4 sm:$0xff]  }
 0x4b0   :  { %2957 = vmatpush1.bf16.xpose.msra.mxu1 %v5328_v8  ;;  %v6633_v8 = vshrl.u32 %v6601_v10, 16 }
 0x4b1   :  { %3043 = vmatprep.subr.bf16.mxu1 %v5333_v46  ;;  %v5396_v46 = vld [vmem:[%s6865_s3 + $0x294] ss:$8 sps:$4 sm:$0xff]  }
 0x4b7   :  { %2983 = vmatmul.mubr.bf16.vlgmr.msra.gmra.mrb[36].mxu1 %v2906_v11  ;;  %v5394_v11 = vld [vmem:[%s6865_s3 + $0x290] ss:$8 sps:$4 sm:$0xff]  }
 0x4b8   :  { %3044 = vmatpush1.bf16.xpose.msra.mxu1 %v5331_v9  ;;  %3075 = vmatprep.mubr.bf16.mxu1 %v3000_v56  ;;  %v3469_v9 = vrot.slane %v6576_v39, 1  ;;  %v5397_v56 = vld [vmem:[%s6865_s3 + $0x2a0] ss:$8 sps:$4 sm:$0xff]  }
 0x4b9   :  { %3045 = vmatprep.subr.bf16.mxu1 %v5336_v27  ;;  %v5399_v27 = vld [vmem:[%s6865_s3 + $0x2a4] ss:$8 sps:$4 sm:$0xff]  }
 0x4c0   :  { %3046 = vmatpush1.bf16.xpose.msra.mxu1 %v5334_v12  ;;  %v5402_v12 = vld [vmem:[%s6865_s3 + $0x2b4] ss:$8 sps:$4 sm:$0xff]  }
 0x4c1   :  { %3047 = vmatprep.subr.bf16.mxu1 %v5339_v60  ;;  %v5400_v60 = vld [vmem:[%s6865_s3 + $0x2b0] ss:$8 sps:$4 sm:$0xff]  }
 0x4c8   :  { %3048 = vmatpush1.bf16.xpose.msra.mxu1 %v5337_v59  ;;  %v5405_v59 = vld [vmem:[%s6865_s3 + $0x2c4] ss:$8 sps:$4 sm:$0xff]  }
 0x4c9   :  { %3049 = vmatprep.subr.bf16.mxu1 %v5342_v0  ;;  %v5403_v0 = vld [vmem:[%s6865_s3 + $0x2c0] ss:$8 sps:$4 sm:$0xff]  }
 0x4d0   :  { %3050 = vmatpush1.bf16.xpose.msra.mxu1 %v5340_v18  ;;  %v3468_v18 = vrot.slane %v6601_v10, 1 }
 0x4d1   :  { %3136 = vmatprep.subr.bf16.mxu1 %v5345_v55  ;;  %v5408_v55 = vld [vmem:[%s6865_s3 + $0x2d4] ss:$8 sps:$4 sm:$0xff]  }
 0x4d7   :  { %3076 = vmatmul.mubr.bf16.vlgmr.msra.gmra.mrb[36].mxu1 %v2999_v1  ;;  %v5406_v1 = vld [vmem:[%s6865_s3 + $0x2d0] ss:$8 sps:$4 sm:$0xff]  }
 0x4d8   :  { %3137 = vmatpush1.bf16.xpose.msra.mxu1 %v5343_v19  ;;  %3168 = vmatprep.mubr.bf16.mxu1 %v3093_v25  ;;  %v3562_v19 = vrot.slane %v6607_v23, 1  ;;  %v5409_v25 = vld [vmem:[%s6865_s3 + $0x2e0] ss:$8 sps:$4 sm:$0xff]  }
 0x4d9   :  { %3138 = vmatprep.subr.bf16.mxu1 %v5348_v20  ;;  %v5411_v20 = vld [vmem:[%s6865_s3 + $0x2e4] ss:$8 sps:$4 sm:$0xff]  }
 0x4e0   :  { %3139 = vmatpush1.bf16.xpose.msra.mxu1 %v5346_v52  ;;  %v5414_v52 = vld [vmem:[%s6865_s3 + $0x2f4] ss:$8 sps:$4 sm:$0xff]  }
 0x4e1   :  { %3140 = vmatprep.subr.bf16.mxu1 %v5351_v42  ;;  %v5412_v42 = vld [vmem:[%s6865_s3 + $0x2f0] ss:$8 sps:$4 sm:$0xff]  }
 0x4e8   :  { %3141 = vmatpush1.bf16.xpose.msra.mxu1 %v5349_v43  ;;  %v5417_v43 = vld [vmem:[%s6865_s3 + $0x304] ss:$8 sps:$4 sm:$0xff]  }
 0x4e9   :  { %3142 = vmatprep.subr.bf16.mxu1 %v5354_v63  ;;  %v5415_v63 = vld [vmem:[%s6865_s3 + $0x300] ss:$8 sps:$4 sm:$0xff]  }
 0x4ea   :  { %v2513_v3 = vpop.f32.mrb[32].mxu1 }
 0x4eb   :  { %v2514_v6 = vadd.f32 %v2513_v3, %v2466_v2  ;;  %v4899_v30 = vpop.f32.mrb[33].mxu1  ;;  %v3561_v2 = vrot.slane %v6633_v8, 1  ;;  %v5420_v3 = vld [vmem:[%s6865_s3 + $0x314] ss:$8 sps:$4 sm:$0xff]  }
 0x4ec   :  { %v2516_v48 = vpop.f32.mrb[34].mxu1  ;;  %v5418_v30 = vld [vmem:[%s6865_s3 + $0x310] ss:$8 sps:$4 sm:$0xff]  }
 0x4ed   :  { %2520 = vst.msk [vmem:[#allocation2] sm:$0x1] %vm2519_vm5, %v2514_v6  ;;  %v4900_v29 = vpop.f32.mrb[35].mxu1  ;;  %v3655_v6 = vrot.slane %v6576_v39, 2  ;;  %v5423_v48 = vld [vmem:[%s6865_s3 + $0x324] ss:$8 sps:$4 sm:$0xff]  }
 0x4ee   :  { %v5426_v29 = vld [vmem:[%s6865_s3 + $0x334] ss:$8 sps:$4 sm:$0xff]  }
 0x4f0   :  { %3143 = vmatpush1.bf16.xpose.msra.mxu1 %v5352_v28  ;;  %v5421_v28 = vld [vmem:[%s6865_s3 + $0x320] ss:$8 sps:$4 sm:$0xff]  }
 0x4f1   :  { %3229 = vmatprep.subr.bf16.mxu1 %v5357_v17  ;;  %v5424_v17 = vld [vmem:[%s6865_s3 + $0x330] ss:$8 sps:$4 sm:$0xff]  }
 0x4f7   :  { %3169 = vmatmul.mubr.bf16.vlgmr.msra.gmra.mrb[36].mxu1 %v3092_v58  ;;  %v5427_v58 = vld [vmem:[%s6865_s3 + $0x340] ss:$8 sps:$4 sm:$0xff]  }
 0x4f8   :  { %3230 = vmatpush1.bf16.xpose.msra.mxu1 %v5355_v54  ;;  %3261 = vmatprep.mubr.bf16.mxu1 %v3186_v34  ;;  %v5429_v54 = vld [vmem:[%s6865_s3 + $0x344] ss:$8 sps:$4 sm:$0xff]   ;;  %v5432_v34 = vld [vmem:[%s6865_s3 + $0x354] ss:$8 sps:$4 sm:$0xff]  }
 0x4f9   :  { %3231 = vmatprep.subr.bf16.mxu1 %v5360_v33  ;;  %v3654_v33 = vrot.slane %v6601_v10, 2 }
 0x500   :  { %3232 = vmatpush1.bf16.xpose.msra.mxu1 %v5358_v35  ;;  %v3748_v35 = vrot.slane %v6607_v23, 2 }
 0x501   :  { %3233 = vmatprep.subr.bf16.mxu1 %v5363_v36  ;;  %v5430_v36 = vld [vmem:[%s6865_s3 + $0x350] ss:$8 sps:$4 sm:$0xff]  }
 0x508   :  { %3234 = vmatpush1.bf16.xpose.msra.mxu1 %v5361_v4  ;;  %v5435_v4 = vld [vmem:[%s6865_s3 + $0x364] ss:$8 sps:$4 sm:$0xff]  }
 0x509   :  { %3235 = vmatprep.subr.bf16.mxu1 %v5366_v16  ;;  %v5433_v16 = vld [vmem:[%s6865_s3 + $0x360] ss:$8 sps:$4 sm:$0xff]  }
 0x510   :  { %3236 = vmatpush1.bf16.xpose.msra.mxu1 %v5364_v37  ;;  %v5438_v37 = vld [vmem:[%s6865_s3 + $0x374] ss:$8 sps:$4 sm:$0xff]  }
 0x511   :  { %3320 = vmatprep.subr.bf16.mxu1 %v5369_v38  ;;  %v5436_v38 = vld [vmem:[%s6865_s3 + $0x370] ss:$8 sps:$4 sm:$0xff]  }
 0x517   :  { %3262 = vmatmul.mubr.bf16.vlgmr.msra.gmra.mrb[36].mxu1 %v3185_v22  ;;  %v3747_v22 = vrot.slane %v6633_v8, 2 }
 0x518   :  { %3321 = vmatpush1.bf16.xpose.msra.mxu1 %v5367_v24  ;;  %3352 = vmatprep.mubr.bf16.mxu1 %v6576_v39  ;;  %v5439_v24 = vld [vmem:[%s6865_s3 + $0x380] ss:$8 sps:$4 sm:$0xff]  }
 0x519   :  { %3322 = vmatprep.subr.bf16.mxu1 %v5372_v21  ;;  %v5444_v21 = vld [vmem:[%s6865_s3 + $0x394] ss:$8 sps:$4 sm:$0xff]  }
 0x520   :  { %3323 = vmatpush1.bf16.xpose.msra.mxu1 %v5370_v15  ;;  %v3841_v15 = vrot.slane %v6576_v39, 3  ;;  %v5450_v39 = vld [vmem:[%s6865_s3 + $0x3b4] ss:$8 sps:$4 sm:$0xff]  }
 0x521   :  { %3324 = vmatprep.subr.bf16.mxu1 %v5375_v40  ;;  %v5442_v40 = vld [vmem:[%s6865_s3 + $0x390] ss:$8 sps:$4 sm:$0xff]  }
 0x528   :  { %3325 = vmatpush1.bf16.xpose.msra.mxu1 %v5373_v32  ;;  %v5447_v32 = vld [vmem:[%s6865_s3 + $0x3a4] ss:$8 sps:$4 sm:$0xff]  }
 0x529   :  { %3326 = vmatprep.subr.bf16.mxu1 %v5378_v41  ;;  %v5445_v41 = vld [vmem:[%s6865_s3 + $0x3a0] ss:$8 sps:$4 sm:$0xff]  }
 0x530   :  { %3327 = vmatpush1.bf16.xpose.msra.mxu1 %v5376_v45  ;;  %v5448_v45 = vld [vmem:[%s6865_s3 + $0x3b0] ss:$8 sps:$4 sm:$0xff]  }
 0x531   :  { %3417 = vmatprep.subr.bf16.mxu1 %v5381_v47  ;;  %v5453_v47 = vld [vmem:[%s6865_s3 + $0x3c4] ss:$8 sps:$4 sm:$0xff]  }
 0x537   :  { %3353 = vmatmul.mubr.bf16.vlgmr.msra.gmra.mrb[36].mxu1 %v6601_v10 }
 0x538   :  { %3418 = vmatpush1.bf16.xpose.msra.mxu1 %v5379_v50  ;;  %3449 = vmatprep.mubr.bf16.mxu1 %v6607_v23  ;;  %v3840_v50 = vrot.slane %v6601_v10, 3  ;;  %v5457_v10 = vld [vmem:[%s6865_s3 + $0x3e0] ss:$8 sps:$4 sm:$0xff]  }
 0x539   :  { %3419 = vmatprep.subr.bf16.mxu1 %v5384_v53  ;;  %v5456_v53 = vld [vmem:[%s6865_s3 + $0x3d4] ss:$8 sps:$4 sm:$0xff]  }
 0x540   :  { %3420 = vmatpush1.bf16.xpose.msra.mxu1 %v5382_v14  ;;  %v3934_v14 = vrot.slane %v6607_v23, 3  ;;  %v5462_v23 = vld [vmem:[%s6865_s3 + $0x3f4] ss:$8 sps:$4 sm:$0xff]  }
 0x541   :  { %3421 = vmatprep.subr.bf16.mxu1 %v5387_v13  ;;  %v5454_v13 = vld [vmem:[%s6865_s3 + $0x3d0] ss:$8 sps:$4 sm:$0xff]  }
 0x548   :  { %3422 = vmatpush1.bf16.xpose.msra.mxu1 %v5385_v61  ;;  %v5459_v61 = vld [vmem:[%s6865_s3 + $0x3e4] ss:$8 sps:$4 sm:$0xff]  }
 0x549   :  { %3423 = vmatprep.subr.bf16.mxu1 %v5390_v51  ;;  %v5460_v51 = vld [vmem:[%s6865_s3 + $0x3f0] ss:$8 sps:$4 sm:$0xff]  }
 0x550   :  { %3424 = vmatpush1.bf16.xpose.msra.mxu1 %v5388_v26  ;;  %v5465_v26 = vld [vmem:[%s6865_s3 + $0x404] ss:$8 sps:$4 sm:$0xff]  }
 0x551   :  { %3512 = vmatprep.subr.bf16.mxu1 %v5393_v44  ;;  %v747_v44 = vadd.f32 %v6275_v31, %v6193_v7  ;;  %v5466_v7 = vld [vmem:[%s6865_s3 + $0x410] ss:$8 sps:$4 sm:$0xff]  }
 0x557   :  { %3450 = vmatmul.mubr.bf16.vlgmr.msra.gmra.mrb[36].mxu1 %v6633_v8 }
 0x558   :  { %3513 = vmatpush1.bf16.xpose.msra.mxu1 %v5391_v5  ;;  %3544 = vmatprep.mubr.bf16.mxu1 %v3469_v9  ;;  %v759_v5 = vmax.f32 %v747_v44, 0.0  ;;  %v3933_v9 = vrot.slane %v6633_v8, 3  ;;  %v5469_v8 = vld [vmem:[%s6865_s3 + $0x420] ss:$8 sps:$4 sm:$0xff]  }
 0x559   :  { %3514 = vmatprep.subr.bf16.mxu1 %v5396_v46  ;;  %v5463_v46 = vld [vmem:[%s6865_s3 + $0x400] ss:$8 sps:$4 sm:$0xff]  }
 0x560   :  { %3515 = vmatpush1.bf16.xpose.msra.mxu1 %v5394_v11  ;;  %v5468_v11 = vld [vmem:[%s6865_s3 + $0x414] ss:$8 sps:$4 sm:$0xff]  }
 0x561   :  { %3516 = vmatprep.subr.bf16.mxu1 %v5399_v27  ;;  %v4019_v27 = vpack.c.bf16 %v759_v5, %v759_v5 }
 0x568   :  { %3517 = vmatpush1.bf16.xpose.msra.mxu1 %v5397_v56  ;;  %v5471_v56 = vld [vmem:[%s6865_s3 + $0x424] ss:$8 sps:$4 sm:$0xff]  }
 0x569   :  { %3518 = vmatprep.subr.bf16.mxu1 %v5402_v12  ;;  %v5474_v12 = vld [vmem:[%s6865_s3 + $0x434] ss:$8 sps:$4 sm:$0xff]  }
 0x570   :  { %3519 = vmatpush1.bf16.xpose.msra.mxu1 %v5400_v60  ;;  %v5472_v60 = vld [vmem:[%s6865_s3 + $0x430] ss:$8 sps:$4 sm:$0xff]  }
 0x571   :  { %3605 = vmatprep.subr.bf16.mxu1 %v5405_v59  ;;  %v746_v59 = vadd.f32 %v6275_v31, %v6185_v57  ;;  %v5478_v57 = vld [vmem:[%s6865_s3 + $0x450] ss:$8 sps:$4 sm:$0xff]   ;;  %v5483_v31 = vld [vmem:[%s6865_s3 + $0x464] ss:$8 sps:$4 sm:$0xff]  }
 0x577   :  { %3545 = vmatmul.mubr.bf16.vlgmr.msra.gmra.mrb[36].mxu1 %v3468_v18  ;;  %v758_v18 = vmax.f32 %v746_v59, 0.0 }
 0x578   :  { %3606 = vmatpush1.bf16.xpose.msra.mxu1 %v5403_v0  ;;  %3637 = vmatprep.mubr.bf16.mxu1 %v3562_v19  ;;  %v5477_v0 = vld [vmem:[%s6865_s3 + $0x444] ss:$8 sps:$4 sm:$0xff]  }
 0x579   :  { %3607 = vmatprep.subr.bf16.mxu1 %v5408_v55  ;;  %v5475_v55 = vld [vmem:[%s6865_s3 + $0x440] ss:$8 sps:$4 sm:$0xff]   ;;  %v4018_v19 = vpack.c.bf16 %v758_v18, %v758_v18 }
 0x580   :  { %3608 = vmatpush1.bf16.xpose.msra.mxu1 %v5406_v1  ;;  %v5480_v1 = vld [vmem:[%s6865_s3 + $0x454] ss:$8 sps:$4 sm:$0xff]  }
 0x581   :  { %3609 = vmatprep.subr.bf16.mxu1 %v5411_v20  ;;  %v4121_v20 = vshrl.u32 %v4019_v27, 16 }
 0x588   :  { %3610 = vmatpush1.bf16.xpose.msra.mxu1 %v5409_v25  ;;  %v5481_v25 = vld [vmem:[%s6865_s3 + $0x460] ss:$8 sps:$4 sm:$0xff]  }
 0x589   :  { %3611 = vmatprep.subr.bf16.mxu1 %v5414_v52  ;;  %v5486_v52 = vld [vmem:[%s6865_s3 + $0x474] ss:$8 sps:$4 sm:$0xff]  }
 0x590   :  { %3612 = vmatpush1.bf16.xpose.msra.mxu1 %v5412_v42  ;;  %v5484_v42 = vld [vmem:[%s6865_s3 + $0x470] ss:$8 sps:$4 sm:$0xff]  }
 0x591   :  { %3698 = vmatprep.subr.bf16.mxu1 %v5417_v43  ;;  %v4118_v43 = vshrl.u32 %v4018_v19, 16 }
 0x597   :  { %3638 = vmatmul.mubr.bf16.vlgmr.msra.gmra.mrb[36].mxu1 %v3561_v2 }
 0x598   :  { %3699 = vmatpush1.bf16.xpose.msra.mxu1 %v5415_v63  ;;  %3730 = vmatprep.mubr.bf16.mxu1 %v3655_v6  ;;  %v5487_v63 = vld [vmem:[%s6867_s5] sm:$0x1f]   ;;  %s5516_s5 = smov [#allocation2]  }
 0x599   :  { %3700 = vmatprep.subr.bf16.mxu1 %v5420_v3  ;;  %v4220_v2 = vsel %vm2472_vm3, %v5487_v63, 0  ;;  %v2521_v3 = vld [vmem:[%s6866_s4] sm:$0x1]  ;;  %s4269_s16 = sshll.u32 %s5516_s5, 4  ;;  %s4270_s16 = int_to_ptr.vmem [resolvable:$true] %s4269_s16 }
 0x59a   :  { %4902 = vmatpush3.bf16.xpose.msra.mxu0 %v4220_v2  ;;  %s5488_s4 = scalar_lea.vmem %s4270_s16, 32  ;;  %p5493_p1 = scmp.lt.s32.totalorder %s4270_s16, %s4270_s16 }
 0x59b   :  { %p5489_p0 = scmp.ne.s32.totalorder %s4270_s16, %s5488_s4  ;;  %p5494_p2 = scmp.lt.s32.totalorder %s5488_s4, %s5488_s4 }
 0x59d   :  { %p5495_p3 = por %p5494_p2, %p5493_p1 }
 0x59f   :  { %p5496_p4 = pnand %p5495_p3, %p5489_p0 }
 0x5a0   :  { %3701 = vmatpush1.bf16.xpose.msra.mxu1 %v5418_v30 }
 0x5a1   :  { %3702 = vmatprep.subr.bf16.mxu1 %v5423_v48 }
 0x5a8   :  { %3703 = vmatpush1.bf16.xpose.msra.mxu1 %v5421_v28 }
 0x5a9   :  { %3704 = vmatprep.subr.bf16.mxu1 %v5426_v29 }
 0x5b0   :  { %3705 = vmatpush1.bf16.xpose.msra.mxu1 %v5424_v17 }
 0x5b1   :  { %3791 = vmatprep.subr.bf16.mxu1 %v5429_v54 }
 0x5b7   :  { %3731 = vmatmul.mubr.bf16.vlgmr.msra.gmra.mrb[36].mxu1 %v3654_v33 }
 0x5b8   :  { %3792 = vmatpush1.bf16.xpose.msra.mxu1 %v5427_v58  ;;  %3823 = vmatprep.mubr.bf16.mxu1 %v3748_v35  ;;  %v4210_v58 = vld [vmem:[%s6868_s6] sm:$0x1] }
 0x5b9   :  { %3793 = vmatprep.subr.bf16.mxu1 %v5432_v34 }
 0x5c0   :  { %3794 = vmatpush1.bf16.xpose.msra.mxu1 %v5430_v36 }
 0x5c1   :  { %3795 = vmatprep.subr.bf16.mxu1 %v5435_v4 }
 0x5c8   :  { %3796 = vmatpush1.bf16.xpose.msra.mxu1 %v5433_v16 }
 0x5c9   :  { %3797 = vmatprep.subr.bf16.mxu1 %v5438_v37 }
 0x5d0   :  { %3798 = vmatpush1.bf16.xpose.msra.mxu1 %v5436_v38 }
 0x5d1   :  { %3884 = vmatprep.subr.bf16.mxu1 %v5441_v62 }
 0x5d7   :  { %3824 = vmatmul.mubr.bf16.vlgmr.msra.gmra.mrb[36].mxu1 %v3747_v22 }
 0x5d8   :  { %3885 = vmatpush1.bf16.xpose.msra.mxu1 %v5439_v24  ;;  %3916 = vmatprep.mubr.bf16.mxu1 %v3841_v15 }
 0x5d9   :  { %3886 = vmatprep.subr.bf16.mxu1 %v5444_v21 }
 0x5e0   :  { %3887 = vmatpush1.bf16.xpose.msra.mxu1 %v5442_v40 }
 0x5e1   :  { %3888 = vmatprep.subr.bf16.mxu1 %v5447_v32 }
 0x5e8   :  { %3889 = vmatpush1.bf16.xpose.msra.mxu1 %v5445_v41 }
 0x5e9   :  { %3890 = vmatprep.subr.bf16.mxu1 %v5450_v39 }
 0x5f0   :  { %3891 = vmatpush1.bf16.xpose.msra.mxu1 %v5448_v45 }
 0x5f1   :  { %3977 = vmatprep.subr.bf16.mxu1 %v5453_v47 }
 0x5f7   :  { %3917 = vmatmul.mubr.bf16.vlgmr.msra.gmra.mrb[36].mxu1 %v3840_v50 }
 0x5f8   :  { %3978 = vmatpush1.bf16.xpose.msra.mxu1 %v5451_v49  ;;  %4009 = vmatprep.mubr.bf16.mxu1 %v3934_v14 }
 0x5f9   :  { %3979 = vmatprep.subr.bf16.mxu1 %v5456_v53 }
 0x600   :  { %3980 = vmatpush1.bf16.xpose.msra.mxu1 %v5454_v13 }
 0x601   :  { %3981 = vmatprep.subr.bf16.mxu1 %v5459_v61 }
 0x608   :  { %3982 = vmatpush1.bf16.xpose.msra.mxu1 %v5457_v10 }
 0x609   :  { %3983 = vmatprep.subr.bf16.mxu1 %v5462_v23 }
 0x610   :  { %3984 = vmatpush1.bf16.xpose.msra.mxu1 %v5460_v51 }
 0x611   :  { %4068 = vmatprep.subr.bf16.mxu1 %v5465_v26 }
 0x617   :  { %4010 = vmatmul.mubr.bf16.vlgmr.msra.gmra.mrb[36].mxu1 %v3933_v9 }
 0x618   :  { %4069 = vmatpush1.bf16.xpose.msra.mxu1 %v5463_v46  ;;  %4100 = vmatprep.mubr.bf16.mxu1 %v4019_v27 }
 0x619   :  { %4070 = vmatprep.subr.bf16.mxu1 %v5468_v11 }
 0x620   :  { %4071 = vmatpush1.bf16.xpose.msra.mxu1 %v5466_v7 }
 0x621   :  { %4072 = vmatprep.subr.bf16.mxu1 %v5471_v56 }
 0x628   :  { %4073 = vmatpush1.bf16.xpose.msra.mxu1 %v5469_v8 }
 0x629   :  { %4074 = vmatprep.subr.bf16.mxu1 %v5474_v12 }
 0x630   :  { %4075 = vmatpush1.bf16.xpose.msra.mxu1 %v5472_v60 }
 0x631   :  { %4165 = vmatprep.subr.bf16.mxu1 %v5477_v0 }
 0x637   :  { %4101 = vmatmul.mubr.bf16.vlgmr.msra.gmra.mrb[36].mxu1 %v4018_v19 }
 0x638   :  { %4166 = vmatpush1.bf16.xpose.msra.mxu1 %v5475_v55  ;;  %4197 = vmatprep.mubr.bf16.mxu1 %v4121_v20 }
 0x639   :  { %4167 = vmatprep.subr.bf16.mxu1 %v5480_v1 }
 0x640   :  { %4168 = vmatpush1.bf16.xpose.msra.mxu1 %v5478_v57 }
 0x641   :  { %4169 = vmatprep.subr.bf16.mxu1 %v5483_v31 }
 0x648   :  { %4170 = vmatpush1.bf16.xpose.msra.mxu1 %v5481_v25 }
 0x649   :  { %4171 = vmatprep.subr.bf16.mxu1 %v5486_v52 }
 0x650   :  { %4172 = vmatpush1.bf16.xpose.msra.mxu1 %v5484_v42 }
 0x657   :  { %4198 = vmatmul.mubr.bf16.vlgmr.msra.gmra.mrb[36].mxu1 %v4118_v43 }
 0x72a   :  { %v4199_v6 = vpop.f32.mrb[36].mxu1 }
 0x72b   :  { %v4908_v30 = vadd.f32 %v4199_v6, %v2521_v3  ;;  %v4201_v48 = vpop.f32.mrb[37].mxu1 }
 0x72c   :  { %v4202_v28 = vpop.f32.mrb[38].mxu1 }
 0x72d   :  { %v4206_v29 = vmax.f32 %v4908_v30, 0.0  ;;  %v4203_v17 = vpop.f32.mrb[39].mxu1 }
 0x72f   :  { %v4207_v54 = vpack.c.bf16 %v4206_v29, %v4206_v29 }
 0x731   :  { %4904 = vmatmul.mubr.msk.bf16.vlgmr.msra.gmra.mrb[36].mxu0 %vm2472_vm3, %v4207_v54 }
 0x804   :  { %v4256_v33 = vpop.f32.mrb[36].mxu0 }
 0x805   :  { %v4257_v34 = vadd.f32 %v4256_v33, %v4210_v58  ;;  %v4905_v35 = vpop.f32.mrb[37].mxu0 }
 0x806   :  { %v4259_v36 = vpop.f32.mrb[38].mxu0 }
 0x807   :  { %4262 = vst.msk [vmem:[#allocation2 + $0x1] sm:$0x1] %vm2519_vm5, %v4257_v34  ;;  %v4906_v4 = vpop.f32.mrb[39].mxu0 }
 0x808   :  { %5499 = shalt.err (!%p5496_p4)
}
 0x809   :  { %s5500_s6 = scalar_lea.hbm %s6869_s7, 32 }
 0x80a   :  { %p5501_p5 = scmp.ne.s32.totalorder %s6869_s7, %s5500_s6  ;;  %p5504_p6 = scmp.lt.u32.totalorder %s5500_s6, %s6869_s7 }
 0x80c   :  { %p5506_p7 = pnand %p5504_p6, %p5501_p5 }
 0x80e   :  { %5509 = shalt.err (!%p5506_p7)
}
 0x80f   :  { %4272 = dma.vmem_to_hbm [thread:$0]  %s4270_s16, 32, %s6869_s7, [#allocation3]  }
 0x810   :  { %5510 = dma.done.wait [#allocation3], 32  }
 0x811   :  { %5511 = vsyncadd [#allocation3], 4294967264 }
 0x812   :  { %4276 = vsyncpa [#allocation3], 1 }

</bundles_post_ra>
